<compile_context>
chip_gen: v6e
topology: v6e:2x2x1
jax: 0.10.0
libtpu: 0.0.40
codegen_flags: <defaults>
</compile_context>

<pallas_src>
import numpy as np
import jax
import jax.numpy as jnp
from jax.experimental import pallas as pl
from jax.experimental.pallas import tpu as pltpu


# ----------------------------- Pallas kernel ------------------------------ #

def _distinct_shifts(num_layers, ksizes):
    """All distinct non-zero tap shifts used by any layer of any stage."""
    shifts = []
    for i in range(num_layers):
        d = 2 ** i
        for ks in ksizes:
            pad = d + (d * (ks - 3)) // 2
            for j in range(ks):
                sh = j * d - pad
                if sh != 0 and sh not in shifts:
                    shifts.append(sh)
    return shifts


def _make_tower_kernel(num_layers, F, dim, C, T, B, ksizes,
                       w_off, b_col, shift_row):
    """Kernel body for the whole TowerModel (both stages, fused per layer)."""
    BT = B * T
    KF = sum(ksizes) * F
    f32 = jnp.float32

    def kernel(x_ref, m_ref, vmask_ref, w_ref, b_ref, out_ref, fin_ref,
               taps_ref):
        # ---- fold B batch elements onto the lane axis ----------------------
        if B == 1:
            x = x_ref[0]                                   # (dim, T)
            m = m_ref[0]                                   # (1,   T)
        else:
            x = jnp.concatenate([x_ref[b] for b in range(B)], axis=1)
            m = jnp.concatenate([m_ref[b] for b in range(B)], axis=1)

        def wslice(name, rows, cols):
            r0 = w_off[name]
            return w_ref[r0:r0 + rows, 0:cols]

        def bias(name, rows):
            c = b_col[name]
            return b_ref[0:rows, c:c + 1]                  # (rows, 1) col bias

        def shifted(hh, sh):
            # y[:, t] = hh[:, t + sh] within each batch element, 0 outside
            # (exact Conv1d zero padding; mask also kills roll wrap-around
            #  and cross-batch-element bleed). Masks are precomputed inputs.
            if sh == 0:
                return hh
            rolled = pltpu.roll(hh, shift=(-sh) % BT, axis=1)
            r = shift_row[sh]
            return rolled * vmask_ref[r:r + 1, :]

        # ---- fused input 1x1 convs of both stages: (2F, dim) @ (dim, BT) ---
        h = jnp.dot(wslice("w_in", 2 * F, dim), x, preferred_element_type=f32)
        h = h + bias("b_in", 2 * F)                        # (2F, BT)

        # ---- dilated residual layers, both stages fused block-diagonally ---
        for i in range(num_layers):
            d = 2 ** i
            # write every tap of both stages into the persistent VMEM scratch
            row0 = 0
            for s, ks in enumerate(ksizes):
                pad = d + (d * (ks - 3)) // 2
                hs = h[s * F:(s + 1) * F, :]
                for j in range(ks):
                    taps_ref[row0 + j * F: row0 + (j + 1) * F, :] = \
                        shifted(hs, j * d - pad)
                row0 += ks * F
            # ONE wide matmul for both stages' dilated convs
            a = jnp.dot(wslice(f"w_d_{i}", 2 * F, KF), taps_ref[...],
                        preferred_element_type=f32)
            a = jnp.maximum(a + bias(f"b_d_{i}", 2 * F), 0.0)   # ReLU
            # ONE block-diagonal matmul for both stages' 1x1 convs
            a = jnp.dot(wslice(f"w_1_{i}", 2 * F, 2 * F), a,
                        preferred_element_type=f32)
            a = a + bias(f"b_1_{i}", 2 * F)
            # TODO(synk): nn.Dropout() treated as identity (eval mode).
            h = (h + a) * m                                # residual + mask

        # ---- TowerModel outputs --------------------------------------------
        # out = out1 + out2
        out_all = h[0:F, :] + h[F:2 * F, :]                # (F, BT)
        # final = conv_out1(out1)*m + conv_out2(out2)*m
        #       = ([w_out1 | w_out2] @ [h1; h2] + (b_out1 + b_out2)) * m
        fin_all = (jnp.dot(wslice("w_out", C, 2 * F), h,
                           preferred_element_type=f32)
                   + bias("b_out_sum", C)) * m             # (C, BT)

        # write outputs directly in (N, F, T) / (N, C, T) layout
        if B == 1:
            out_ref[0] = out_all
            fin_ref[0] = fin_all
        else:
            for b in range(B):
                out_ref[b] = out_all[:, b * T:(b + 1) * T]
                fin_ref[b] = fin_all[:, b * T:(b + 1) * T]

    return kernel


def tower_forward(x, mask01, w_slab, b_slab, layout, *,
                  num_layers, F, C, ksizes):
    """x: (N, dim, T), mask01: (N, 1, T). Returns (out (N,F,T), final (N,C,T))."""
    N, dim, T = x.shape

    # Fold B batch elements onto the lane axis. Target ~2048 lanes per grid
    # step (tiny activations -> VMEM is not a constraint even on v7x), but
    # keep >= 2 grid steps whenever N >= 2 so "parallel" can use both v7x TCs.
    cap = min(N, max(1, 2048 // T))
    if N >= 2:
        cap = min(cap, max(1, N // 2))
    B = 1
    for cand in range(cap, 0, -1):
        if N % cand == 0:
            B = cand
            break
    BT = B * T

    # Precompute per-shift validity masks (exact zero padding semantics).
    shifts = _distinct_shifts(num_layers, ksizes)
    if not shifts:
        shifts = [0]                       # dummy row, never read
    pos = np.arange(BT) % T
    vmask_np = np.stack(
        [((pos + sh >= 0) & (pos + sh < T)).astype(np.float32)
         for sh in shifts], axis=0)                          # (n_shifts, BT)
    shift_row = {sh: r for r, sh in enumerate(shifts)}
    vmask = jnp.asarray(vmask_np)

    w_off, b_col = layout
    kernel = _make_tower_kernel(num_layers, F, dim, C, T, B, ksizes,
                                w_off, b_col, shift_row)
    KF = sum(ksizes) * F

    out, fin = pl.pallas_call(
        kernel,
        out_shape=(
            jax.ShapeDtypeStruct((N, F, T), jnp.float32),
            jax.ShapeDtypeStruct((N, C, T), jnp.float32),
        ),
        grid_spec=pltpu.PrefetchScalarGridSpec(
            num_scalar_prefetch=0,
            grid=(N // B,),
            in_specs=[
                pl.BlockSpec((B, dim, T), lambda n: (n, 0, 0)),
                pl.BlockSpec((B, 1, T), lambda n: (n, 0, 0)),
                pl.BlockSpec(vmask.shape, lambda n: (0, 0)),    # resident
                pl.BlockSpec(w_slab.shape, lambda n: (0, 0)),   # resident
                pl.BlockSpec(b_slab.shape, lambda n: (0, 0)),   # resident
            ],
            out_specs=(
                pl.BlockSpec((B, F, T), lambda n: (n, 0, 0)),
                pl.BlockSpec((B, C, T), lambda n: (n, 0, 0)),
            ),
            scratch_shapes=[pltpu.VMEM((KF, BT), jnp.float32)],  # tap buffer
        ),
        compiler_params=pltpu.CompilerParams(
            dimension_semantics=("parallel",)),   # batch steps independent
    )(x, mask01, vmask, w_slab, b_slab)
    return out, fin


# ------------------------ parameters (deterministic) ----------------------- #

def init_stage_params(key, num_layers, F, dim, C, ks):
    keys = jax.random.split(key, 4 + 4 * num_layers)
    p = {"w_d": [], "b_d": [], "w_1": [], "b_1": []}
    p["w_in"] = jax.random.normal(keys[0], (F, dim, 1), jnp.float32) / np.sqrt(dim)
    p["b_in"] = 0.1 * jax.random.normal(keys[1], (F,), jnp.float32)
    for i in range(num_layers):
        k0, k1, k2, k3 = keys[2 + 4 * i: 6 + 4 * i]
        p["w_d"].append(jax.random.normal(k0, (F, F, ks), jnp.float32)
                        / np.sqrt(F * ks))
        p["b_d"].append(0.1 * jax.random.normal(k1, (F,), jnp.float32))
        p["w_1"].append(jax.random.normal(k2, (F, F, 1), jnp.float32)
                        / np.sqrt(F))
        p["b_1"].append(0.1 * jax.random.normal(k3, (F,), jnp.float32))
    p["w_out"] = jax.random.normal(keys[2 + 4 * num_layers], (C, F, 1),
                                   jnp.float32) / np.sqrt(F)
    p["b_out"] = 0.1 * jax.random.normal(keys[3 + 4 * num_layers], (C,),
                                         jnp.float32)
    return p


def pack_params(p1, p2, num_layers, F, dim, C, ksizes):
    """Pack all weights into one row-stacked slab (block-diagonal per-layer
    fusion of the two stages, zero-padded columns) and all biases into one
    column-per-bias slab. Returns (w_slab, b_slab, (w_off, b_col))."""
    stages = (p1, p2)
    KF = sum(ksizes) * F
    max_cols = max(dim, KF, 2 * F)

    w_blocks = []
    # fused input conv: [w_in_stage1 ; w_in_stage2]  -> (2F, dim)
    w_in = np.concatenate(
        [np.asarray(stages[s]["w_in"][:, :, 0]) for s in (0, 1)], axis=0)
    w_blocks.append(("w_in", w_in))
    for i in range(num_layers):
        # block-diagonal dilated conv: (2F, KF)
        #   rows 0:F   use cols 0:k1*F      (stage-1 taps, stacked per tap)
        #   rows F:2F  use cols k1*F:KF     (stage-2 taps, stacked per tap)
        wd = np.zeros((2 * F, KF), np.float32)
        col0 = 0
        for s, ks in enumerate(ksizes):
            wds = np.asarray(stages[s]["w_d"][i])            # (F, F, ks) OIK
            for j in range(ks):
                wd[s * F:(s + 1) * F, col0 + j * F: col0 + (j + 1) * F] = \
                    wds[:, :, j]
            col0 += ks * F
        w_blocks.append((f"w_d_{i}", wd))
        # block-diagonal 1x1 conv: (2F, 2F)
        w1 = np.zeros((2 * F, 2 * F), np.float32)
        for s in range(2):
            w1[s * F:(s + 1) * F, s * F:(s + 1) * F] = \
                np.asarray(stages[s]["w_1"][i][:, :, 0])
        w_blocks.append((f"w_1_{i}", w1))
    # fused output conv: [w_out_stage1 | w_out_stage2]  -> (C, 2F)
    w_out = np.concatenate(
        [np.asarray(stages[s]["w_out"][:, :, 0]) for s in (0, 1)], axis=1)
    w_blocks.append(("w_out", w_out))

    total_rows = sum(b.shape[0] for _, b in w_blocks)
    w_slab = np.zeros((total_rows, max_cols), np.float32)
    w_off = {}
    r = 0
    for name, blk in w_blocks:
        w_slab[r:r + blk.shape[0], :blk.shape[1]] = blk
        w_off[name] = r
        r += blk.shape[0]

    # biases: one column each, stage-stacked to (2F,) where applicable
    b_cols = [("b_in", np.concatenate([np.asarray(p1["b_in"]),
                                       np.asarray(p2["b_in"])]))]
    for i in range(num_layers):
        b_cols.append((f"b_d_{i}", np.concatenate(
            [np.asarray(stages[s]["b_d"][i]) for s in range(2)])))
        b_cols.append((f"b_1_{i}", np.concatenate(
            [np.asarray(stages[s]["b_1"][i]) for s in range(2)])))
    b_cols.append(("b_out_sum",
                   np.asarray(p1["b_out"]) + np.asarray(p2["b_out"])))

    rmax = max(2 * F, C)
    b_slab = np.zeros((rmax, len(b_cols)), np.float32)
    b_col = {}
    for ci, (name, vec) in enumerate(b_cols):
        b_slab[:vec.shape[0], ci] = vec
        b_col[name] = ci

    return jnp.asarray(w_slab), jnp.asarray(b_slab), (w_off, b_col)


# ---------------------------- pure-JAX reference --------------------------- #

def _conv1d_ref(x, w, b, dilation=1, padding=0):
    y = jax.lax.conv_general_dilated(
        x, w, window_strides=(1,), padding=[(padding, padding)],
        rhs_dilation=(dilation,), dimension_numbers=("NCH", "OIH", "NCH"),
        precision=jax.lax.Precision.HIGHEST)
    return y + b[None, :, None]


def stage_ref(x, mask, p, ks, num_layers):
    m = mask[:, 0:1, :]
    h = _conv1d_ref(x, p["w_in"], p["b_in"])
    for i in range(num_layers):
        d = 2 ** i
        pad = d + (d * (ks - 3)) // 2
        a = jax.nn.relu(_conv1d_ref(h, p["w_d"][i], p["b_d"][i],
                                    dilation=d, padding=pad))
        a = _conv1d_ref(a, p["w_1"][i], p["b_1"][i])
        h = (h + a) * m
    fin = _conv1d_ref(h, p["w_out"], p["b_out"]) * m
    return h, fin


def tower_ref(x, mask, p1, p2, num_layers):
    o1, f1 = stage_ref(x, mask, p1, 3, num_layers)
    o2, f2 = stage_ref(x, mask, p2, 5, num_layers)
    return o1 + o2, f1 + f2


# ----------------------------------- main ---------------------------------- #

if __name__ == "__main__":
    num_layers, num_f_maps, dim, num_classes = 2, 32, 8, 8
    N, T = 2, 128

    key = jax.random.PRNGKey(0)
    kx, km, k1, k2 = jax.random.split(key, 4)
    x = jax.random.normal(kx, (N, dim, T), jnp.float32)
    mask = (jax.random.uniform(km, (N, num_classes, T)) > 0.2).astype(jnp.float32)

    p1 = init_stage_params(k1, num_layers, num_f_maps, dim, num_classes, 3)
    p2 = init_stage_params(k2, num_layers, num_f_maps, dim, num_classes, 5)
    w_slab, b_slab, layout = pack_params(p1, p2, num_layers, num_f_maps, dim,
                                         num_classes, (3, 5))

    out, final = tower_forward(
        x, mask[:, 0:1, :], w_slab, b_slab, layout,
        num_layers=num_layers, F=num_f_maps, C=num_classes, ksizes=(3, 5))
    out, final = jax.block_until_ready((out, final))

    out_r, final_r = tower_ref(x, mask, p1, p2, num_layers)
    np.testing.assert_allclose(np.asarray(out), np.asarray(out_r),
                               rtol=1e-3, atol=1e-3)
    np.testing.assert_allclose(np.asarray(final), np.asarray(final_r),
                               rtol=1e-3, atol=1e-3)

    print("KERNEL_OK")
</pallas_src>

<mosaic_0001>
module attributes {stable_mosaic.version = 11 : i64} {
  func.func @kernel(%arg0: i32, %arg1: memref<1x8x128xf32, #tpu.memory_space<vmem>>, %arg2: memref<1x1x128xf32, #tpu.memory_space<vmem>>, %arg3: memref<6x128xf32, #tpu.memory_space<vmem>>, %arg4: memref<328x256xf32, #tpu.memory_space<vmem>>, %arg5: memref<64x6xf32, #tpu.memory_space<vmem>>, %arg6: memref<1x32x128xf32, #tpu.memory_space<vmem>>, %arg7: memref<1x8x128xf32, #tpu.memory_space<vmem>>, %arg8: memref<256x128xf32, #tpu.memory_space<vmem>>) attributes {dimension_semantics = [#tpu.dimension_semantics<parallel>], iteration_bounds = array<i64: 2>, scalar_prefetch = 0 : i64, scratch_operands = 1 : i64, tpu.core_type = #tpu.core_type<tc>, window_params = [{transform_indices = @transform_0, window_bounds = array<i64: 1, 8, 128>}, {transform_indices = @transform_1, window_bounds = array<i64: 1, 1, 128>}, {pipeline_mode = #tpu.pipeline_mode<synchronous>, transform_indices = @transform_2, window_bounds = array<i64: 6, 128>}, {pipeline_mode = #tpu.pipeline_mode<synchronous>, transform_indices = @transform_3, window_bounds = array<i64: 328, 256>}, {pipeline_mode = #tpu.pipeline_mode<synchronous>, transform_indices = @transform_4, window_bounds = array<i64: 64, 6>}, {transform_indices = @transform_5, window_bounds = array<i64: 1, 32, 128>}, {transform_indices = @transform_6, window_bounds = array<i64: 1, 8, 128>}]} {
    %c0 = arith.constant 0 : index
    %c0_0 = arith.constant 0 : index
    %c0_1 = arith.constant 0 : index
    %0 = vector.load %arg1[%c0, %c0_0, %c0_1] : memref<1x8x128xf32, #tpu.memory_space<vmem>>, vector<1x8x128xf32>
    %1 = vector.shape_cast %0 : vector<1x8x128xf32> to vector<8x128xf32>
    %c0_2 = arith.constant 0 : index
    %c0_3 = arith.constant 0 : index
    %c0_4 = arith.constant 0 : index
    %2 = vector.load %arg2[%c0_2, %c0_3, %c0_4] : memref<1x1x128xf32, #tpu.memory_space<vmem>>, vector<1x1x128xf32>
    %3 = vector.shape_cast %2 : vector<1x1x128xf32> to vector<1x128xf32>
    %c0_5 = arith.constant 0 : index
    %c0_6 = arith.constant 0 : index
    %4 = vector.load %arg4[%c0_5, %c0_6] : memref<328x256xf32, #tpu.memory_space<vmem>>, vector<64x8xf32>
    %cst = arith.constant dense<0.000000e+00> : vector<64x128xf32>
    %5 = tpu.matmul %4, %1, %cst {dimension_numbers = #tpu.dot_dimension_numbers<[1], [0], [0], [1], [0, 0, 1, 1], [], []>} : vector<64x8xf32>, vector<8x128xf32>, vector<64x128xf32> -> vector<64x128xf32>
    %c0_7 = arith.constant 0 : index
    %c0_8 = arith.constant 0 : index
    %6 = vector.load %arg5[%c0_7, %c0_8] : memref<64x6xf32, #tpu.memory_space<vmem>>, vector<64x1xf32>
    %7 = vector.broadcast %6 : vector<64x1xf32> to vector<64x128xf32>
    %8 = arith.addf %5, %7 : vector<64x128xf32>
    %9 = vector.extract_strided_slice %8 {offsets = [0, 0], sizes = [32, 128], strides = [1, 1]} : vector<64x128xf32> to vector<32x128xf32>
    %c1_i32 = arith.constant 1 : i32
    %10 = tpu.dynamic_rotate %9 by %c1_i32 dim 1 : vector<32x128xf32>, i32 -> vector<32x128xf32>
    %c0_9 = arith.constant 0 : index
    %c0_10 = arith.constant 0 : index
    %11 = vector.load %arg3[%c0_9, %c0_10] : memref<6x128xf32, #tpu.memory_space<vmem>>, vector<1x128xf32>
    %12 = vector.broadcast %11 : vector<1x128xf32> to vector<32x128xf32>
    %13 = arith.mulf %10, %12 : vector<32x128xf32>
    %c0_11 = arith.constant 0 : index
    %c0_12 = arith.constant 0 : index
    %14 = vector.load %arg8[%c0_11, %c0_12] : memref<256x128xf32, #tpu.memory_space<vmem>>, vector<32x128xf32>
    tpu.vector_store %arg8[%c0_11, %c0_12], %13 {strides = array<i32>} : memref<256x128xf32, #tpu.memory_space<vmem>>, vector<32x128xf32>,
    %c32 = arith.constant 32 : index
    %c0_13 = arith.constant 0 : index
    %15 = vector.load %arg8[%c32, %c0_13] : memref<256x128xf32, #tpu.memory_space<vmem>>, vector<32x128xf32>
    tpu.vector_store %arg8[%c32, %c0_13], %9 {strides = array<i32>} : memref<256x128xf32, #tpu.memory_space<vmem>>, vector<32x128xf32>,
    %c127_i32 = arith.constant 127 : i32
    %16 = tpu.dynamic_rotate %9 by %c127_i32 dim 1 : vector<32x128xf32>, i32 -> vector<32x128xf32>
    %c1 = arith.constant 1 : index
    %c0_14 = arith.constant 0 : index
    %17 = vector.load %arg3[%c1, %c0_14] : memref<6x128xf32, #tpu.memory_space<vmem>>, vector<1x128xf32>
    %18 = vector.broadcast %17 : vector<1x128xf32> to vector<32x128xf32>
    %19 = arith.mulf %16, %18 : vector<32x128xf32>
    %c64 = arith.constant 64 : index
    %c0_15 = arith.constant 0 : index
    %20 = vector.load %arg8[%c64, %c0_15] : memref<256x128xf32, #tpu.memory_space<vmem>>, vector<32x128xf32>
    tpu.vector_store %arg8[%c64, %c0_15], %19 {strides = array<i32>} : memref<256x128xf32, #tpu.memory_space<vmem>>, vector<32x128xf32>,
    %21 = vector.extract_strided_slice %8 {offsets = [32, 0], sizes = [32, 128], strides = [1, 1]} : vector<64x128xf32> to vector<32x128xf32>
    %c2_i32 = arith.constant 2 : i32
    %22 = tpu.dynamic_rotate %21 by %c2_i32 dim 1 : vector<32x128xf32>, i32 -> vector<32x128xf32>
    %c2 = arith.constant 2 : index
    %c0_16 = arith.constant 0 : index
    %23 = vector.load %arg3[%c2, %c0_16] : memref<6x128xf32, #tpu.memory_space<vmem>>, vector<1x128xf32>
    %24 = vector.broadcast %23 : vector<1x128xf32> to vector<32x128xf32>
    %25 = arith.mulf %22, %24 : vector<32x128xf32>
    %c96 = arith.constant 96 : index
    %c0_17 = arith.constant 0 : index
    %26 = vector.load %arg8[%c96, %c0_17] : memref<256x128xf32, #tpu.memory_space<vmem>>, vector<32x128xf32>
    tpu.vector_store %arg8[%c96, %c0_17], %25 {strides = array<i32>} : memref<256x128xf32, #tpu.memory_space<vmem>>, vector<32x128xf32>,
    %c1_i32_18 = arith.constant 1 : i32
    %27 = tpu.dynamic_rotate %21 by %c1_i32_18 dim 1 : vector<32x128xf32>, i32 -> vector<32x128xf32>
    %c0_19 = arith.constant 0 : index
    %c0_20 = arith.constant 0 : index
    %28 = vector.load %arg3[%c0_19, %c0_20] : memref<6x128xf32, #tpu.memory_space<vmem>>, vector<1x128xf32>
    %29 = vector.broadcast %28 : vector<1x128xf32> to vector<32x128xf32>
    %30 = arith.mulf %27, %29 : vector<32x128xf32>
    %c128 = arith.constant 128 : index
    %c0_21 = arith.constant 0 : index
    %31 = vector.load %arg8[%c128, %c0_21] : memref<256x128xf32, #tpu.memory_space<vmem>>, vector<32x128xf32>
    tpu.vector_store %arg8[%c128, %c0_21], %30 {strides = array<i32>} : memref<256x128xf32, #tpu.memory_space<vmem>>, vector<32x128xf32>,
    %c160 = arith.constant 160 : index
    %c0_22 = arith.constant 0 : index
    %32 = vector.load %arg8[%c160, %c0_22] : memref<256x128xf32, #tpu.memory_space<vmem>>, vector<32x128xf32>
    tpu.vector_store %arg8[%c160, %c0_22], %21 {strides = array<i32>} : memref<256x128xf32, #tpu.memory_space<vmem>>, vector<32x128xf32>,
    %c127_i32_23 = arith.constant 127 : i32
    %33 = tpu.dynamic_rotate %21 by %c127_i32_23 dim 1 : vector<32x128xf32>, i32 -> vector<32x128xf32>
    %c1_24 = arith.constant 1 : index
    %c0_25 = arith.constant 0 : index
    %34 = vector.load %arg3[%c1_24, %c0_25] : memref<6x128xf32, #tpu.memory_space<vmem>>, vector<1x128xf32>
    %35 = vector.broadcast %34 : vector<1x128xf32> to vector<32x128xf32>
    %36 = arith.mulf %33, %35 : vector<32x128xf32>
    %c192 = arith.constant 192 : index
    %c0_26 = arith.constant 0 : index
    %37 = vector.load %arg8[%c192, %c0_26] : memref<256x128xf32, #tpu.memory_space<vmem>>, vector<32x128xf32>
    tpu.vector_store %arg8[%c192, %c0_26], %36 {strides = array<i32>} : memref<256x128xf32, #tpu.memory_space<vmem>>, vector<32x128xf32>,
    %c126_i32 = arith.constant 126 : i32
    %38 = tpu.dynamic_rotate %21 by %c126_i32 dim 1 : vector<32x128xf32>, i32 -> vector<32x128xf32>
    %c3 = arith.constant 3 : index
    %c0_27 = arith.constant 0 : index
    %39 = vector.load %arg3[%c3, %c0_27] : memref<6x128xf32, #tpu.memory_space<vmem>>, vector<1x128xf32>
    %40 = vector.broadcast %39 : vector<1x128xf32> to vector<32x128xf32>
    %41 = arith.mulf %38, %40 : vector<32x128xf32>
    %c224 = arith.constant 224 : index
    %c0_28 = arith.constant 0 : index
    %42 = vector.load %arg8[%c224, %c0_28] : memref<256x128xf32, #tpu.memory_space<vmem>>, vector<32x128xf32>
    tpu.vector_store %arg8[%c224, %c0_28], %41 {strides = array<i32>} : memref<256x128xf32, #tpu.memory_space<vmem>>, vector<32x128xf32>,
    %c64_29 = arith.constant 64 : index
    %c0_30 = arith.constant 0 : index
    %43 = vector.load %arg4[%c64_29, %c0_30] : memref<328x256xf32, #tpu.memory_space<vmem>>, vector<64x256xf32>
    %c0_31 = arith.constant 0 : index
    %c0_32 = arith.constant 0 : index
    %44 = vector.load %arg8[%c0_31, %c0_32] : memref<256x128xf32, #tpu.memory_space<vmem>>, vector<256x128xf32>
    %cst_33 = arith.constant dense<0.000000e+00> : vector<64x128xf32>
    %45 = tpu.matmul %43, %44, %cst_33 {dimension_numbers = #tpu.dot_dimension_numbers<[1], [0], [0], [1], [0, 0, 1, 1], [], []>} : vector<64x256xf32>, vector<256x128xf32>, vector<64x128xf32> -> vector<64x128xf32>
    %c0_34 = arith.constant 0 : index
    %c1_35 = arith.constant 1 : index
    %46 = vector.load %arg5[%c0_34, %c1_35] : memref<64x6xf32, #tpu.memory_space<vmem>>, vector<64x1xf32>
    %47 = vector.broadcast %46 : vector<64x1xf32> to vector<64x128xf32>
    %48 = arith.addf %45, %47 : vector<64x128xf32>
    %cst_36 = arith.constant 0.000000e+00 : f32
    %49 = vector.broadcast %cst_36 : f32 to vector<64x128xf32>
    %50 = arith.maximumf %48, %49 : vector<64x128xf32>
    %c128_37 = arith.constant 128 : index
    %c0_38 = arith.constant 0 : index
    %51 = vector.load %arg4[%c128_37, %c0_38] : memref<328x256xf32, #tpu.memory_space<vmem>>, vector<64x64xf32>
    %cst_39 = arith.constant dense<0.000000e+00> : vector<64x128xf32>
    %52 = tpu.matmul %51, %50, %cst_39 {dimension_numbers = #tpu.dot_dimension_numbers<[1], [0], [0], [1], [0, 0, 1, 1], [], []>} : vector<64x64xf32>, vector<64x128xf32>, vector<64x128xf32> -> vector<64x128xf32>
    %c0_40 = arith.constant 0 : index
    %c2_41 = arith.constant 2 : index
    %53 = vector.load %arg5[%c0_40, %c2_41] : memref<64x6xf32, #tpu.memory_space<vmem>>, vector<64x1xf32>
    %54 = vector.broadcast %53 : vector<64x1xf32> to vector<64x128xf32>
    %55 = arith.addf %52, %54 : vector<64x128xf32>
    %56 = arith.addf %8, %55 : vector<64x128xf32>
    %57 = vector.broadcast %3 : vector<1x128xf32> to vector<64x128xf32>
    %58 = arith.mulf %56, %57 : vector<64x128xf32>
    %59 = vector.extract_strided_slice %58 {offsets = [0, 0], sizes = [32, 128], strides = [1, 1]} : vector<64x128xf32> to vector<32x128xf32>
    %c2_i32_42 = arith.constant 2 : i32
    %60 = tpu.dynamic_rotate %59 by %c2_i32_42 dim 1 : vector<32x128xf32>, i32 -> vector<32x128xf32>
    %c2_43 = arith.constant 2 : index
    %c0_44 = arith.constant 0 : index
    %61 = vector.load %arg3[%c2_43, %c0_44] : memref<6x128xf32, #tpu.memory_space<vmem>>, vector<1x128xf32>
    %62 = vector.broadcast %61 : vector<1x128xf32> to vector<32x128xf32>
    %63 = arith.mulf %60, %62 : vector<32x128xf32>
    %c0_45 = arith.constant 0 : index
    %c0_46 = arith.constant 0 : index
    %64 = vector.load %arg8[%c0_45, %c0_46] : memref<256x128xf32, #tpu.memory_space<vmem>>, vector<32x128xf32>
    tpu.vector_store %arg8[%c0_45, %c0_46], %63 {strides = array<i32>} : memref<256x128xf32, #tpu.memory_space<vmem>>, vector<32x128xf32>,
    %c32_47 = arith.constant 32 : index
    %c0_48 = arith.constant 0 : index
    %65 = vector.load %arg8[%c32_47, %c0_48] : memref<256x128xf32, #tpu.memory_space<vmem>>, vector<32x128xf32>
    tpu.vector_store %arg8[%c32_47, %c0_48], %59 {strides = array<i32>} : memref<256x128xf32, #tpu.memory_space<vmem>>, vector<32x128xf32>,
    %c126_i32_49 = arith.constant 126 : i32
    %66 = tpu.dynamic_rotate %59 by %c126_i32_49 dim 1 : vector<32x128xf32>, i32 -> vector<32x128xf32>
    %c3_50 = arith.constant 3 : index
    %c0_51 = arith.constant 0 : index
    %67 = vector.load %arg3[%c3_50, %c0_51] : memref<6x128xf32, #tpu.memory_space<vmem>>, vector<1x128xf32>
    %68 = vector.broadcast %67 : vector<1x128xf32> to vector<32x128xf32>
    %69 = arith.mulf %66, %68 : vector<32x128xf32>
    %c64_52 = arith.constant 64 : index
    %c0_53 = arith.constant 0 : index
    %70 = vector.load %arg8[%c64_52, %c0_53] : memref<256x128xf32, #tpu.memory_space<vmem>>, vector<32x128xf32>
    tpu.vector_store %arg8[%c64_52, %c0_53], %69 {strides = array<i32>} : memref<256x128xf32, #tpu.memory_space<vmem>>, vector<32x128xf32>,
    %71 = vector.extract_strided_slice %58 {offsets = [32, 0], sizes = [32, 128], strides = [1, 1]} : vector<64x128xf32> to vector<32x128xf32>
    %c4_i32 = arith.constant 4 : i32
    %72 = tpu.dynamic_rotate %71 by %c4_i32 dim 1 : vector<32x128xf32>, i32 -> vector<32x128xf32>
    %c4 = arith.constant 4 : index
    %c0_54 = arith.constant 0 : index
    %73 = vector.load %arg3[%c4, %c0_54] : memref<6x128xf32, #tpu.memory_space<vmem>>, vector<1x128xf32>
    %74 = vector.broadcast %73 : vector<1x128xf32> to vector<32x128xf32>
    %75 = arith.mulf %72, %74 : vector<32x128xf32>
    %c96_55 = arith.constant 96 : index
    %c0_56 = arith.constant 0 : index
    %76 = vector.load %arg8[%c96_55, %c0_56] : memref<256x128xf32, #tpu.memory_space<vmem>>, vector<32x128xf32>
    tpu.vector_store %arg8[%c96_55, %c0_56], %75 {strides = array<i32>} : memref<256x128xf32, #tpu.memory_space<vmem>>, vector<32x128xf32>,
    %c2_i32_57 = arith.constant 2 : i32
    %77 = tpu.dynamic_rotate %71 by %c2_i32_57 dim 1 : vector<32x128xf32>, i32 -> vector<32x128xf32>
    %c2_58 = arith.constant 2 : index
    %c0_59 = arith.constant 0 : index
    %78 = vector.load %arg3[%c2_58, %c0_59] : memref<6x128xf32, #tpu.memory_space<vmem>>, vector<1x128xf32>
    %79 = vector.broadcast %78 : vector<1x128xf32> to vector<32x128xf32>
    %80 = arith.mulf %77, %79 : vector<32x128xf32>
    %c128_60 = arith.constant 128 : index
    %c0_61 = arith.constant 0 : index
    %81 = vector.load %arg8[%c128_60, %c0_61] : memref<256x128xf32, #tpu.memory_space<vmem>>, vector<32x128xf32>
    tpu.vector_store %arg8[%c128_60, %c0_61], %80 {strides = array<i32>} : memref<256x128xf32, #tpu.memory_space<vmem>>, vector<32x128xf32>,
    %c160_62 = arith.constant 160 : index
    %c0_63 = arith.constant 0 : index
    %82 = vector.load %arg8[%c160_62, %c0_63] : memref<256x128xf32, #tpu.memory_space<vmem>>, vector<32x128xf32>
    tpu.vector_store %arg8[%c160_62, %c0_63], %71 {strides = array<i32>} : memref<256x128xf32, #tpu.memory_space<vmem>>, vector<32x128xf32>,
    %c126_i32_64 = arith.constant 126 : i32
    %83 = tpu.dynamic_rotate %71 by %c126_i32_64 dim 1 : vector<32x128xf32>, i32 -> vector<32x128xf32>
    %c3_65 = arith.constant 3 : index
    %c0_66 = arith.constant 0 : index
    %84 = vector.load %arg3[%c3_65, %c0_66] : memref<6x128xf32, #tpu.memory_space<vmem>>, vector<1x128xf32>
    %85 = vector.broadcast %84 : vector<1x128xf32> to vector<32x128xf32>
    %86 = arith.mulf %83, %85 : vector<32x128xf32>
    %c192_67 = arith.constant 192 : index
    %c0_68 = arith.constant 0 : index
    %87 = vector.load %arg8[%c192_67, %c0_68] : memref<256x128xf32, #tpu.memory_space<vmem>>, vector<32x128xf32>
    tpu.vector_store %arg8[%c192_67, %c0_68], %86 {strides = array<i32>} : memref<256x128xf32, #tpu.memory_space<vmem>>, vector<32x128xf32>,
    %c124_i32 = arith.constant 124 : i32
    %88 = tpu.dynamic_rotate %71 by %c124_i32 dim 1 : vector<32x128xf32>, i32 -> vector<32x128xf32>
    %c5 = arith.constant 5 : index
    %c0_69 = arith.constant 0 : index
    %89 = vector.load %arg3[%c5, %c0_69] : memref<6x128xf32, #tpu.memory_space<vmem>>, vector<1x128xf32>
    %90 = vector.broadcast %89 : vector<1x128xf32> to vector<32x128xf32>
    %91 = arith.mulf %88, %90 : vector<32x128xf32>
    %c224_70 = arith.constant 224 : index
    %c0_71 = arith.constant 0 : index
    %92 = vector.load %arg8[%c224_70, %c0_71] : memref<256x128xf32, #tpu.memory_space<vmem>>, vector<32x128xf32>
    tpu.vector_store %arg8[%c224_70, %c0_71], %91 {strides = array<i32>} : memref<256x128xf32, #tpu.memory_space<vmem>>, vector<32x128xf32>,
    %c192_72 = arith.constant 192 : index
    %c0_73 = arith.constant 0 : index
    %93 = vector.load %arg4[%c192_72, %c0_73] : memref<328x256xf32, #tpu.memory_space<vmem>>, vector<64x256xf32>
    %c0_74 = arith.constant 0 : index
    %c0_75 = arith.constant 0 : index
    %94 = vector.load %arg8[%c0_74, %c0_75] : memref<256x128xf32, #tpu.memory_space<vmem>>, vector<256x128xf32>
    %cst_76 = arith.constant dense<0.000000e+00> : vector<64x128xf32>
    %95 = tpu.matmul %93, %94, %cst_76 {dimension_numbers = #tpu.dot_dimension_numbers<[1], [0], [0], [1], [0, 0, 1, 1], [], []>} : vector<64x256xf32>, vector<256x128xf32>, vector<64x128xf32> -> vector<64x128xf32>
    %c0_77 = arith.constant 0 : index
    %c3_78 = arith.constant 3 : index
    %96 = vector.load %arg5[%c0_77, %c3_78] : memref<64x6xf32, #tpu.memory_space<vmem>>, vector<64x1xf32>
    %97 = vector.broadcast %96 : vector<64x1xf32> to vector<64x128xf32>
    %98 = arith.addf %95, %97 : vector<64x128xf32>
    %cst_79 = arith.constant 0.000000e+00 : f32
    %99 = vector.broadcast %cst_79 : f32 to vector<64x128xf32>
    %100 = arith.maximumf %98, %99 : vector<64x128xf32>
    %c256 = arith.constant 256 : index
    %c0_80 = arith.constant 0 : index
    %101 = vector.load %arg4[%c256, %c0_80] : memref<328x256xf32, #tpu.memory_space<vmem>>, vector<64x64xf32>
    %cst_81 = arith.constant dense<0.000000e+00> : vector<64x128xf32>
    %102 = tpu.matmul %101, %100, %cst_81 {dimension_numbers = #tpu.dot_dimension_numbers<[1], [0], [0], [1], [0, 0, 1, 1], [], []>} : vector<64x64xf32>, vector<64x128xf32>, vector<64x128xf32> -> vector<64x128xf32>
    %c0_82 = arith.constant 0 : index
    %c4_83 = arith.constant 4 : index
    %103 = vector.load %arg5[%c0_82, %c4_83] : memref<64x6xf32, #tpu.memory_space<vmem>>, vector<64x1xf32>
    %104 = vector.broadcast %103 : vector<64x1xf32> to vector<64x128xf32>
    %105 = arith.addf %102, %104 : vector<64x128xf32>
    %106 = arith.addf %58, %105 : vector<64x128xf32>
    %107 = vector.broadcast %3 : vector<1x128xf32> to vector<64x128xf32>
    %108 = arith.mulf %106, %107 : vector<64x128xf32>
    %109 = vector.extract_strided_slice %108 {offsets = [0, 0], sizes = [32, 128], strides = [1, 1]} : vector<64x128xf32> to vector<32x128xf32>
    %110 = vector.extract_strided_slice %108 {offsets = [32, 0], sizes = [32, 128], strides = [1, 1]} : vector<64x128xf32> to vector<32x128xf32>
    %111 = arith.addf %109, %110 : vector<32x128xf32>
    %c320 = arith.constant 320 : index
    %c0_84 = arith.constant 0 : index
    %112 = vector.load %arg4[%c320, %c0_84] : memref<328x256xf32, #tpu.memory_space<vmem>>, vector<8x64xf32>
    %cst_85 = arith.constant dense<0.000000e+00> : vector<8x128xf32>
    %113 = tpu.matmul %112, %108, %cst_85 {dimension_numbers = #tpu.dot_dimension_numbers<[1], [0], [0], [1], [0, 0, 1, 1], [], []>} : vector<8x64xf32>, vector<64x128xf32>, vector<8x128xf32> -> vector<8x128xf32>
    %c0_86 = arith.constant 0 : index
    %c5_87 = arith.constant 5 : index
    %114 = vector.load %arg5[%c0_86, %c5_87] : memref<64x6xf32, #tpu.memory_space<vmem>>, vector<8x1xf32>
    %115 = vector.broadcast %114 : vector<8x1xf32> to vector<8x128xf32>
    %116 = arith.addf %113, %115 : vector<8x128xf32>
    %117 = vector.broadcast %3 : vector<1x128xf32> to vector<8x128xf32>
    %118 = arith.mulf %116, %117 : vector<8x128xf32>
    %c0_88 = arith.constant 0 : index
    %c0_89 = arith.constant 0 : index
    %c0_90 = arith.constant 0 : index
    %119 = vector.load %arg6[%c0_88, %c0_89, %c0_90] : memref<1x32x128xf32, #tpu.memory_space<vmem>>, vector<1x32x128xf32>
    %120 = vector.shape_cast %119 : vector<1x32x128xf32> to vector<32x128xf32>
    %121 = vector.shape_cast %111 : vector<32x128xf32> to vector<1x32x128xf32>
    tpu.vector_store %arg6[%c0_88, %c0_89, %c0_90], %121 {strides = array<i32>} : memref<1x32x128xf32, #tpu.memory_space<vmem>>, vector<1x32x128xf32>,
    %c0_91 = arith.constant 0 : index
    %c0_92 = arith.constant 0 : index
    %c0_93 = arith.constant 0 : index
    %122 = vector.load %arg7[%c0_91, %c0_92, %c0_93] : memref<1x8x128xf32, #tpu.memory_space<vmem>>, vector<1x8x128xf32>
    %123 = vector.shape_cast %122 : vector<1x8x128xf32> to vector<8x128xf32>
    %124 = vector.shape_cast %118 : vector<8x128xf32> to vector<1x8x128xf32>
    tpu.vector_store %arg7[%c0_91, %c0_92, %c0_93], %124 {strides = array<i32>} : memref<1x8x128xf32, #tpu.memory_space<vmem>>, vector<1x8x128xf32>,
    return
  }
  func.func @transform_0(%arg0: i32) -> (i32, i32, i32) {
    %c0_i32 = arith.constant 0 : i32
    %c0_i32_0 = arith.constant 0 : i32
    %c0_i32_1 = arith.constant 0 : i32
    return %arg0, %c0_i32, %c0_i32_0 : i32, i32, i32
  }
  func.func @transform_1(%arg0: i32) -> (i32, i32, i32) {
    %c0_i32 = arith.constant 0 : i32
    %c0_i32_0 = arith.constant 0 : i32
    %c0_i32_1 = arith.constant 0 : i32
    return %arg0, %c0_i32, %c0_i32_0 : i32, i32, i32
  }
  func.func @transform_2(%arg0: i32) -> (i32, i32) {
    %c0_i32 = arith.constant 0 : i32
    %c0_i32_0 = arith.constant 0 : i32
    %c0_i32_1 = arith.constant 0 : i32
    return %c0_i32, %c0_i32_0 : i32, i32
  }
  func.func @transform_3(%arg0: i32) -> (i32, i32) {
    %c0_i32 = arith.constant 0 : i32
    %c0_i32_0 = arith.constant 0 : i32
    %c0_i32_1 = arith.constant 0 : i32
    return %c0_i32, %c0_i32_0 : i32, i32
  }
  func.func @transform_4(%arg0: i32) -> (i32, i32) {
    %c0_i32 = arith.constant 0 : i32
    %c0_i32_0 = arith.constant 0 : i32
    %c0_i32_1 = arith.constant 0 : i32
    return %c0_i32, %c0_i32_0 : i32, i32
  }
  func.func @transform_5(%arg0: i32) -> (i32, i32, i32) {
    %c0_i32 = arith.constant 0 : i32
    %c0_i32_0 = arith.constant 0 : i32
    %c0_i32_1 = arith.constant 0 : i32
    return %arg0, %c0_i32, %c0_i32_0 : i32, i32, i32
  }
  func.func @transform_6(%arg0: i32) -> (i32, i32, i32) {
    %c0_i32 = arith.constant 0 : i32
    %c0_i32_0 = arith.constant 0 : i32
    %c0_i32_1 = arith.constant 0 : i32
    return %arg0, %c0_i32, %c0_i32_0 : i32, i32, i32
  }
}

</mosaic_0001>

<bundles_post_ra>
// kernel: tpu_custom_call.1
= control target key start
LH: loop header
LB: loop body
LE: loop exit
PB: predicated region body
PF: predicated region fallthrough
CT: control target
= control target key end

     0   :  { %12 = vsyncpa [#allocation4], 0  ;;  %s2824_s0 = inlined_call_operand.vmem [shape: f32[2,8,128], index: 0, kind: input, shape index: {}]   ;;  %s2825_s1 = inlined_call_operand.vmem [shape: f32[2,1,128], index: 1, kind: input, shape index: {}]   ;;  %s2826_s2 = inlined_call_operand.vmem [shape: f32[6,128], index: 2, kind: input, shape index: {}]   ;;  %s2827_s3 = inlined_call_operand.hbm [shape: f32[328,256], index: 3, kind: input, shape index: {}]   ;;  %s2828_s4 = inlined_call_operand.vmem [shape: f32[64,6], index: 4, kind: input, shape index: {}]   ;;  %s2829_s5 = inlined_call_operand.hbm [shape: f32[2,32,128], index: 5, kind: output, shape index: {0}]   ;;  %s2830_s6 = inlined_call_operand.hbm [shape: f32[2,8,128], index: 6, kind: output, shape index: {1}]  }
   0x1   :  { %13 = vsyncpa [#allocation5], 0 }
   0x2   :  { %15 = vsyncpa [#allocation5 + $0x1], 0 }
   0x3   :  { %16 = vsyncpa [#allocation8], 0 }
   0x4   :  { %18 = vsyncpa [#allocation8 + $0x1], 0  ;;  %s2343_s21 = smov 0   ;;  %s2345_s22 = smov 0  }
   0x5   :  { %s2347_s23 = smov 0   ;;  %s2349_s24 = smov 0  }
   0x6 LB: > { %s2364_s25 = sadd.s32 4294967295, %s2285_s24   ;;  %s1775_s26 = sadd.s32 4294967294, %s2285_s24   ;;  %s2285_s24 = sphi %s2349_s24, %s2838_s24   ;;  %s2281_s23 = sphi %s2347_s23, %s2837_s23   ;;  %s2277_s22 = sphi %s2345_s22, %s2836_s22   ;;  %s2273_s21 = sphi %s2343_s21, %s2835_s21  }
   0x7   : > { %s2368_s27 = sadd.s32 1, %s2285_s24   ;;  %s146_s28 = sadd.s32 1, %s2281_s23 }
   0x8   : > { %s143_s29 = ssub.s32 %s2285_s24, %s2368_s27  ;;  %p156_p0 = scmp.ne.s32.totalorder %s2281_s23, %s2277_s22 }
   0x9   : > { %p144_p1 = scmp.eq.s32.totalorder %s143_s29, 0  ;;  %p157_p2 = scmp.eq.s32.totalorder %s2364_s25, 1 }
   0xa   : > { %p162_p3 = scmp.ne.s32.totalorder %s2277_s22, %s2273_s21  ;;  %p163_p4 = scmp.eq.s32.totalorder %s1775_s26, 1 }
   0xb   : > { %s2379_s30 = scalar_select %p144_p1, %s2281_s23, %s146_s28  }
   0xc   : > { %p2381_p5 = por %p157_p2, %p156_p0  ;;  %p2385_p6 = por %p163_p4, %p162_p3 }
   0xd   : > { %p1776_p7 = scmp.ge.s32.totalorder %s2285_s24, 1  ;;  %p196_p8 = scmp.lt.s32.totalorder %s2285_s24, 3 }
   0xe   : > { %s2832_s8 = scalar_select %p2385_p6, 1, 0 }
   0xf   : > { %p2100_p9 = scmp.eq.s32.totalorder %s2364_s25, 0  ;;  %p2392_p10 = pnand %p1776_p7, %p196_p8 }
  0x10   : > { %s2287_s10 = smov [#allocation3]  }
  0x11   : > { %s211_s11 = sshll.u32 %s2287_s10, 4  ;;  %p2089_p11 = pneg %p2392_p10  ;;  %s212_s11 = int_to_ptr.vmem [resolvable:$true] %s211_s11 }
  0x12   : > { %s2176_s12 = scalar_lea.vmem %s212_s11, 10496  ;;  %p2184_p3 = scmp.lt.s32.totalorder %s212_s11, %s212_s11 }
  0x13   : > { %p2090_p12 = pnand %p2100_p9, %p2089_p11  ;;  %p2177_p0 = scmp.ne.s32.totalorder %s212_s11, %s2176_s12 }
  0x14   : > { %p2185_p4 = scmp.lt.s32.totalorder %s2176_s12, %s2176_s12 }
  0x15   : > { %p2167_p13 = pneg %p2090_p12 }
  0x16   : > { %p2186_p6 = por %p2185_p4, %p2184_p3 }
  0x17   : > { %p2179_p1 = pnand %p2177_p0, %p2167_p13 }
  0x19   : > { %p2180_p2 = pneg %p2179_p1 }
  0x1b   : > { %p2187_p7 = pnand %p2186_p6, %p2180_p2 }
  0x1d   : > { %2190 = shalt.err (!%p2187_p7)
}
  0x1e   : > { %s2288_s13 = smov 256   ;;  %s2289_s14 = smov 16  }
  0x1f   : > { %2092 = dma.hbm_to_vmem [thread:$0]  (!%p2090_p12), %s2827_s3, 10496, %s212_s11, [#allocation4], %s2288_s13, %s2288_s13, %s2289_s14  }
  0x20   : > { %243 = sbr.rel (%p2392_p10) target bundleno = 1709 (0x6ad), region = 40 }
  0x25   : > { %2260 = dma.done.wait (%p2100_p9), [#allocation4], 10496  }
  0x26   : > { %2262 = vsyncadd (%p2100_p9), [#allocation4], 4294956800  ;;  %p280_p8 = scmp.lt.s32.totalorder %s2364_s25, 1  ;;  %v2290_v0 = vmov 0   ;;  %vm345_vm0 = vcmask 64512   ;;  %v289_v2 = vld [vmem:[#allocation3] sm:$0xff] }
  0x27   : > { %2154 = vset.pattern.permute.xlu0 %v2290_v0  ;;  %2155 = vset.pattern.permute.xlu1 %v2290_v0  ;;  %v290_v3 = vld [vmem:[#allocation3 + $0x10] sm:$0xff]  ;;  %v291_v4 = vld [vmem:[#allocation3 + $0x20] sm:$0xff]  ;;  %v2422_v5 = vld [vmem:[%s2828_s4 + $0x38] sm:$0xff]  ;;  %s2291_s9 = smov 127   ;;  %s2292_s10 = smov 2   ;;  %v2295_v43 = vmov 1  }
  0x28   : > { %s2411_s17 = scalar_select %p280_p8, %s2364_s25, 1  ;;  %1994 = vmatprep.mubr.msk.f32.mxu0 %vm345_vm0, %v289_v2  ;;  %v2427_v6 = vld [vmem:[%s2828_s4 + $0x28] sm:$0xff]  ;;  %v292_v7 = vld [vmem:[#allocation3 + $0x30] sm:$0xff]  ;;  %342 = vperm.xlu0 %2154, %v2422_v5   ;;  %v293_v8 = vld [vmem:[#allocation3 + $0x40] sm:$0xff]  ;;  %vm858_vm1 = vcmask 523264   ;;  %vm2302_vm2 = vmmov 0  }
  0x29   : > { %332 = vperm.xlu1 %2155, %v2427_v6   ;;  %v2435_v9 = vld [vmem:[%s2828_s4 + $0x30] sm:$0xff]  ;;  %v2440_v10 = vld [vmem:[%s2828_s4 + $0x20] sm:$0xff]  ;;  %v2449_v13 = vld [vmem:[%s2828_s4 + $0x18] sm:$0xff]  ;;  %s2293_s11 = smov 126   ;;  %s2294_s12 = smov 1  }
  0x2a   : > { %s1783_s18 = sshll.u32 %s2411_s17, 3  ;;  %v294_v11 = vld [vmem:[#allocation3 + $0x50] sm:$0xff]  ;;  %v295_v12 = vld [vmem:[#allocation3 + $0x60] sm:$0xff]  ;;  %v2463_v16 = vld [vmem:[%s2828_s4 + $0x8] sm:$0xff]  ;;  %s1829_s28 = sshll.u32 %s2364_s25, 9 }
  0x2b   : > { %s283_s26 = scalar_lea.vmem %s2824_s0, %s1783_s18  ;;  %v2454_v14 = vld [vmem:[%s2828_s4 + $0x10] sm:$0xff]  ;;  %v2468_v17 = vld [vmem:[%s2828_s4] sm:$0xff]  ;;  %v610_v42 = vld [vmem:[#allocation3 + $0x88] sm:$0xff]  ;;  %s2724_s18 = sand.u32 1, %s2277_s22  }
  0x2c   : > { %v287_v1 = vld [vmem:[%s283_s26] sm:$0xff]  ;;  %337 = vperm.xlu0 %2154, %v2435_v9   ;;  %v296_v15 = vld [vmem:[#allocation3 + $0x70] sm:$0xff]  ;;  %769 = vmatprep.mubr.f32.mxu1 %v610_v42  ;;  %s1781_s19 = sshll.u32 %s2724_s18, 5 }
  0x2d   : > { %1992 = vmatprep.subr.mxu0 %v287_v1  ;;  %327 = vperm.xlu1 %2155, %v2440_v10   ;;  %v2540_v49 = vld [vmem:[%s2826_s2 + $0x2] ss:$0 sm:$0xff]  ;;  %v2545_v50 = vld [vmem:[%s2826_s2 + $0x3] ss:$0 sm:$0xff]  ;;  %s2738_s20 = scalar_lea.vmem [#allocation6], %s1781_s19 }
  0x2e   : > { %1993 = vmatpush3.msra.mxu0 %v287_v1  ;;  %v1793_v1 = vld [vmem:[%s2826_s2 + $0x1] ss:$0 sm:$0xff]  ;;  %s1647_s26 = sshll.u32 %s2738_s20, 4  ;;  %s2757_s26 = int_to_ptr.vmem [resolvable:$true] %s1647_s26 }
  0x2f   : > { %1995 = vmatmul.mubr.msk.f32.vlgmr.msra.gmra.mxu0 %vm345_vm0, %v290_v3 }
  0x30   : > { %1997 = vmatprep.mubr.msk.f32.mxu0 %vm345_vm0, %v291_v4  ;;  %322 = vperm.xlu0 %2154, %v2449_v13  }
  0x31   : > { %317 = vperm.xlu1 %2155, %v2454_v14  }
  0x33   : > { %1998 = vmatmul.mubr.msk.f32.gmra.mxu0 %vm345_vm0, %v292_v7 }
  0x34   : > { %2000 = vmatprep.mubr.msk.f32.mxu0 %vm345_vm0, %v293_v8  ;;  %312 = vperm.xlu0 %2154, %v2463_v16  }
  0x35   : > { %307 = vperm.xlu1 %2155, %v2468_v17  }
  0x37   : > { %2001 = vmatmul.mubr.msk.f32.gmra.mxu0 %vm345_vm0, %v294_v11 }
  0x38   : > { %2003 = vmatprep.mubr.msk.f32.mxu0 %vm345_vm0, %v295_v12  ;;  %2156 = vset.pattern.permute.xlu0 %v2295_v43 }
  0x39   : > { %2157 = vset.pattern.permute.xlu1 %v2295_v43 }
  0x3b   : > { %2004 = vmatmul.mubr.msk.f32.gmra.mxu0 %vm345_vm0, %v296_v15 }
  0xa3   : > { %v343_v18 = vpop.permute.xlu0 %342 }
  0xa4   : > { %v333_v25 = vpop.permute.xlu1 %332 }
  0xa7   : > { %v338_v19 = vpop.permute.xlu0 %337 }
  0xa8   : > { %v328_v30 = vpop.permute.xlu1 %327 }
  0xab   : > { %v323_v22 = vpop.permute.xlu0 %322 }
  0xac   : > { %v318_v36 = vpop.permute.xlu1 %317 }
  0xaf   : > { %v313_v38 = vpop.permute.xlu0 %312 }
  0xb0   : > { %v308_v40 = vpop.permute.xlu1 %307 }
  0xef   : > { %v1996_v20 = vpop.f32.mrf.mxu0 }
  0xf0   : > { %v2507_v39 = vadd.f32 %v1996_v20, %v313_v38 }
  0xf1   : > { %v436_v21 = vpop.f32.mrf.mxu0 }
  0xf2   : > { %v2513_v41 = vadd.f32 %v436_v21, %v308_v40 }
  0xf3   : > { %v1999_v23 = vpop.f32.mrf.mxu0 }
  0xf4   : > { %v2473_v24 = vadd.f32 %v1999_v23, %v323_v22 }
  0xf5   : > { %v446_v26 = vpop.f32.mrf.mxu0 }
  0xf6   : > { %506 = vrot.lane.b32.xlu1 %v2473_v24, %s2291_s9  ;;  %v2501_v37 = vadd.f32 %v446_v26, %v318_v36 }
  0xf7   : > { %v2002_v27 = vpop.f32.mrf.mxu0 }
  0xf8   : > { %v2477_v28 = vadd.f32 %v2002_v27, %v333_v25 }
  0xf9   : > { %v456_v29 = vpop.f32.mrf.mxu0 }
  0xfa   : > { %523 = vrot.lane.b32.xlu1 %v2477_v28, %s2292_s10  ;;  %590 = vrot.lane.b32.xlu0 %v2477_v28, %s2293_s11  ;;  %v2483_v31 = vadd.f32 %v456_v29, %v328_v30  ;;  %v1792_v29 = vld [vmem:[%s2826_s2] ss:$0 sm:$0xff] }
  0xfb   : > { %v2005_v32 = vpop.f32.mrf.mxu0 }
  0xfc   : > { %v2489_v33 = vadd.f32 %v2005_v32, %v343_v18 }
  0xfd   : > { %v466_v34 = vpop.f32.mrf.mxu0 }
  0xfe   : > { %521 = vrot.lane.b32.xlu1 %v2483_v31, %s2292_s10  ;;  %588 = vrot.lane.b32.xlu0 %v2483_v31, %s2293_s11  ;;  %v2495_v35 = vadd.f32 %v466_v34, %v338_v19 }
 0x102   : > { %527 = vrot.lane.b32.xlu1 %v2489_v33, %s2292_s10  ;;  %594 = vrot.lane.b32.xlu0 %v2489_v33, %s2293_s11 }
 0x106   : > { %525 = vrot.lane.b32.xlu1 %v2495_v35, %s2292_s10  ;;  %573 = vrot.lane.b32.xlu0 %v2489_v33, %s2291_s9 }
 0x10a   : > { %592 = vrot.lane.b32.xlu0 %v2495_v35, %s2293_s11  ;;  %504 = vrot.lane.b32.xlu1 %v2501_v37, %s2291_s9 }
 0x10e   : > { %569 = vrot.lane.b32.xlu0 %v2477_v28, %s2291_s9  ;;  %502 = vrot.lane.b32.xlu1 %v2507_v39, %s2291_s9 }
 0x112   : > { %571 = vrot.lane.b32.xlu0 %v2495_v35, %s2291_s9  ;;  %500 = vrot.lane.b32.xlu1 %v2513_v41, %s2291_s9 }
 0x116   : > { %567 = vrot.lane.b32.xlu0 %v2483_v31, %s2291_s9  ;;  %481 = vrot.lane.b32.xlu1 %v2473_v24, %s2294_s12  ;;  %s286_s9 = scalar_lea.vmem %s2825_s1, %s2411_s17  ;;  %s2297_s17 = smov 4  }
 0x11a   : > { %548 = vrot.lane.b32.xlu0 %v2489_v33, %s2294_s12  ;;  %479 = vrot.lane.b32.xlu1 %v2501_v37, %s2294_s12 }
 0x11e   : > { %544 = vrot.lane.b32.xlu0 %v2477_v28, %s2294_s12  ;;  %477 = vrot.lane.b32.xlu1 %v2507_v39, %s2294_s12 }
 0x122   : > { %546 = vrot.lane.b32.xlu0 %v2495_v35, %s2294_s12  ;;  %475 = vrot.lane.b32.xlu1 %v2513_v41, %s2294_s12 }
 0x126   : > { %542 = vrot.lane.b32.xlu0 %v2483_v31, %s2294_s12  ;;  %697 = vperm.xlu1 %2157, %v2435_v9   ;;  %s2298_s12 = smov 124  }
 0x12a   : > { %702 = vperm.xlu0 %2156, %v2422_v5   ;;  %692 = vperm.xlu1 %2157, %v2427_v6  }
 0x12e   : > { %687 = vperm.xlu0 %2156, %v2440_v10   ;;  %682 = vperm.xlu1 %2157, %v2449_v13  }
 0x132   : > { %677 = vperm.xlu0 %2156, %v2454_v14   ;;  %672 = vperm.xlu1 %2157, %v2463_v16  }
 0x136   : > { %667 = vperm.xlu0 %2156, %v2468_v17  }
 0x168   : > { %v507_v44 = vpop.permute.xlu1 %506 }
 0x169   : > { %v516_v7 = vmul.f32 %v1793_v1, %v507_v44 }
 0x16c   : > { %v524_v45 = vpop.permute.xlu1 %523  ;;  %v591_v46 = vpop.permute.xlu0 %590 }
 0x16d   : > { %v602_v61 = vmul.f32 %v2545_v50, %v591_v46  ;;  %v535_v62 = vmul.f32 %v2540_v49, %v524_v45 }
 0x170   : > { %v522_v47 = vpop.permute.xlu1 %521  ;;  %v589_v48 = vpop.permute.xlu0 %588 }
 0x171   : > { %v601_v2 = vmul.f32 %v2545_v50, %v589_v48  ;;  %v534_v3 = vmul.f32 %v2540_v49, %v522_v47  ;;  %v609_v48 = vld [vmem:[#allocation3 + $0x80] sm:$0xff] }
 0x174   : > { %v528_v51 = vpop.permute.xlu1 %527  ;;  %v595_v52 = vpop.permute.xlu0 %594 }
 0x175   : > { %v537_v53 = vmul.f32 %v2540_v49, %v528_v51  ;;  %v604_v54 = vmul.f32 %v2545_v50, %v595_v52  ;;  %v612_v51 = vld [vmem:[#allocation3 + $0x98] sm:$0xff]  ;;  %v611_v52 = vld [vmem:[#allocation3 + $0x90] sm:$0xff] }
 0x177   : > { %1839 = vmatprep.subr.mxu1 %v604_v54  ;;  %v613_v54 = vld [vmem:[#allocation3 + $0xa0] sm:$0xff] }
 0x178   : > { %v526_v55 = vpop.permute.xlu1 %525  ;;  %1840 = vmatpush3.msra.mxu1 %v537_v53  ;;  %v574_v56 = vpop.permute.xlu0 %573  ;;  %v614_v53 = vld [vmem:[#allocation3 + $0xa8] sm:$0xff] }
 0x179   : > { %v536_v60 = vmul.f32 %v2540_v49, %v526_v55  ;;  %v583_v4 = vmul.f32 %v1793_v1, %v574_v56  ;;  %v616_v55 = vld [vmem:[#allocation3 + $0xb8] sm:$0xff]  ;;  %v615_v56 = vld [vmem:[#allocation3 + $0xb0] sm:$0xff] }
 0x17c   : > { %v593_v57 = vpop.permute.xlu0 %592  ;;  %v505_v58 = vpop.permute.xlu1 %504 }
 0x17d   : > { %v603_v59 = vmul.f32 %v2545_v50, %v593_v57  ;;  %v515_v15 = vmul.f32 %v1793_v1, %v505_v58  ;;  %v618_v57 = vld [vmem:[#allocation3 + $0xc8] sm:$0xff]  ;;  %v617_v58 = vld [vmem:[#allocation3 + $0xc0] sm:$0xff] }
 0x17f   : > { %1841 = vmatprep.subr.mxu1 %v603_v59  ;;  %v620_v59 = vld [vmem:[#allocation3 + $0xd8] sm:$0xff] }
 0x180   : > { %1842 = vmatpush3.msra.mxu1 %v536_v60  ;;  %v570_v63 = vpop.permute.xlu0 %569  ;;  %v503_v0 = vpop.permute.xlu1 %502  ;;  %v619_v60 = vld [vmem:[#allocation3 + $0xd0] sm:$0xff] }
 0x181   : > { %1843 = vmatprep.subr.mxu1 %v602_v61  ;;  %v581_v18 = vmul.f32 %v1793_v1, %v570_v63  ;;  %v514_v19 = vmul.f32 %v1793_v1, %v503_v0  ;;  %v622_v61 = vld [vmem:[#allocation3 + $0xe8] sm:$0xff]  ;;  %v624_v63 = vld [vmem:[#allocation3 + $0xf8] sm:$0xff]  ;;  %v623_v0 = vld [vmem:[#allocation3 + $0xf0] sm:$0xff] }
 0x182   : > { %1844 = vmatpush3.msra.mxu1 %v535_v62  ;;  %v621_v62 = vld [vmem:[#allocation3 + $0xe0] sm:$0xff] }
 0x183   : > { %1845 = vmatprep.subr.mxu1 %v601_v2  ;;  %v2296_v2 = vmov 2  }
 0x184   : > { %1846 = vmatpush3.msra.mxu1 %v534_v3  ;;  %v572_v8 = vpop.permute.xlu0 %571  ;;  %v501_v11 = vpop.permute.xlu1 %500  ;;  %2158 = vset.pattern.permute.xlu1 %v2296_v2 }
 0x185   : > { %v582_v12 = vmul.f32 %v1793_v1, %v572_v8  ;;  %1847 = vmatprep.subr.mxu1 %v583_v4  ;;  %v513_v23 = vmul.f32 %v1793_v1, %v501_v11  ;;  %2159 = vset.pattern.permute.xlu0 %v2296_v2 }
 0x186   : > { %1848 = vmatpush3.msra.mxu1 %v516_v7  ;;  %855 = vperm.xlu1 %2158, %v2422_v5  }
 0x187   : > { %1849 = vmatprep.subr.mxu1 %v582_v12  ;;  %851 = vperm.xlu0 %2159, %v2435_v9  }
 0x188   : > { %v568_v20 = vpop.permute.xlu0 %567  ;;  %1850 = vmatpush3.msra.mxu1 %v515_v15  ;;  %v482_v21 = vpop.permute.xlu1 %481 }
 0x189   : > { %v580_v22 = vmul.f32 %v1793_v1, %v568_v20  ;;  %1851 = vmatprep.subr.mxu1 %v581_v18  ;;  %v491_v34 = vmul.f32 %v1792_v29, %v482_v21  ;;  %v818_v1 = vld [vmem:[#allocation3 + $0x100] sm:$0xff] }
 0x18a   : > { %1852 = vmatpush3.msra.mxu1 %v514_v19  ;;  %2022 = vmatprep.mubr.msk.f32.mxu0 %vm858_vm1, %v818_v1 }
 0x18b   : > { %1853 = vmatprep.subr.mxu1 %v580_v22  ;;  %847 = vperm.xlu1 %2158, %v2427_v6  }
 0x18c   : > { %v549_v25 = vpop.permute.xlu0 %548  ;;  %1854 = vmatpush3.msra.mxu1 %v513_v23  ;;  %v480_v26 = vpop.permute.xlu1 %479  ;;  %839 = vperm.xlu0 %2159, %v2449_v13  }
 0x18d   : > { %1855 = vmatprep.subr.mxu1 %v2489_v33  ;;  %v558_v32 = vmul.f32 %v1792_v29, %v549_v25  ;;  %v490_v40 = vmul.f32 %v1792_v29, %v480_v26 }
 0x18e   : > { %1856 = vmatpush3.msra.mxu1 %v2473_v24 }
 0x18f   : > { %1857 = vmatprep.subr.mxu1 %v2495_v35  ;;  %843 = vperm.xlu1 %2158, %v2440_v10  }
 0x190   : > { %v545_v27 = vpop.permute.xlu0 %544  ;;  %1858 = vmatpush3.msra.mxu1 %v2501_v37  ;;  %v478_v30 = vpop.permute.xlu1 %477  ;;  %831 = vperm.xlu0 %2159, %v2463_v16  }
 0x191   : > { %1859 = vmatprep.subr.mxu1 %v2477_v28  ;;  %v556_v42 = vmul.f32 %v1792_v29, %v545_v27  ;;  %v489_v44 = vmul.f32 %v1792_v29, %v478_v30 }
 0x192   : > { %1860 = vmatpush3.msra.mxu1 %v2507_v39 }
 0x193   : > { %1861 = vmatprep.subr.mxu1 %v2483_v31  ;;  %835 = vperm.xlu1 %2158, %v2454_v14  }
 0x194   : > { %v547_v36 = vpop.permute.xlu0 %546  ;;  %1862 = vmatpush3.msra.mxu1 %v2513_v41  ;;  %v476_v43 = vpop.permute.xlu1 %475 }
 0x195   : > { %v557_v38 = vmul.f32 %v1792_v29, %v547_v36  ;;  %1863 = vmatprep.subr.mxu1 %v558_v32  ;;  %v488_v47 = vmul.f32 %v1792_v29, %v476_v43 }
 0x196   : > { %1864 = vmatpush3.msra.mxu1 %v491_v34 }
 0x197   : > { %1865 = vmatprep.subr.mxu1 %v557_v38  ;;  %827 = vperm.xlu1 %2158, %v2468_v17  }
 0x198   : > { %v543_v45 = vpop.permute.xlu0 %542  ;;  %1866 = vmatpush3.msra.mxu1 %v490_v40 }
 0x199   : > { %v555_v46 = vmul.f32 %v1792_v29, %v543_v45  ;;  %1867 = vmatprep.subr.mxu1 %v556_v42 }
 0x19a   : > { %1868 = vmatpush3.msra.mxu1 %v489_v44 }
 0x19b   : > { %1869 = vmatprep.subr.mxu1 %v555_v46 }
 0x19c   : > { %1870 = vmatpush3.msra.mxu1 %v488_v47 }
 0x19d   : > { %770 = vmatmul.mubr.f32.vlgmr.msra.gmra.mxu1 %v609_v48 }
 0x19e   : > { %774 = vmatprep.mubr.f32.mxu1 %v612_v51 }
 0x1a1   : > { %775 = vmatmul.mubr.f32.gmra.mxu1 %v611_v52  ;;  %v698_v22 = vpop.permute.xlu1 %697 }
 0x1a2   : > { %779 = vmatprep.mubr.f32.mxu1 %v614_v53 }
 0x1a5   : > { %780 = vmatmul.mubr.f32.gmra.mxu1 %v613_v54  ;;  %v703_v25 = vpop.permute.xlu0 %702  ;;  %v693_v29 = vpop.permute.xlu1 %692 }
 0x1a6   : > { %784 = vmatprep.mubr.f32.mxu1 %v616_v55 }
 0x1a9   : > { %785 = vmatmul.mubr.f32.gmra.mxu1 %v615_v56  ;;  %v688_v34 = vpop.permute.xlu0 %687  ;;  %v683_v45 = vpop.permute.xlu1 %682 }
 0x1aa   : > { %789 = vmatprep.mubr.f32.mxu1 %v618_v57 }
 0x1ad   : > { %790 = vmatmul.mubr.f32.gmra.mxu1 %v617_v58  ;;  %v678_v51 = vpop.permute.xlu0 %677  ;;  %v673_v58 = vpop.permute.xlu1 %672 }
 0x1ae   : > { %794 = vmatprep.mubr.f32.mxu1 %v620_v59 }
 0x1b1   : > { %795 = vmatmul.mubr.f32.gmra.mxu1 %v619_v60 }
 0x1b2   : > { %799 = vmatprep.mubr.f32.mxu1 %v622_v61 }
 0x1b5   : > { %800 = vmatmul.mubr.f32.gmra.mxu1 %v621_v62  ;;  %v668_v62 = vpop.permute.xlu0 %667 }
 0x1b6   : > { %804 = vmatprep.mubr.f32.mxu1 %v624_v63 }
 0x1b9   : > { %805 = vmatmul.mubr.f32.gmra.mxu1 %v623_v0 }
 0x25d   : > { %v1871_v3 = vpop.f32.mrf.mxu1 }
 0x25f   : > { %v1872_v4 = vpop.f32.mrf.mxu1 }
 0x260   : > { %v1873_v59 = vadd.f32 %v1872_v4, %v1871_v3  ;;  %v819_v3 = vld [vmem:[#allocation3 + $0x110] sm:$0xff]  ;;  %v820_v4 = vld [vmem:[#allocation3 + $0x120] sm:$0xff] }
 0x261   : > { %v1874_v7 = vpop.f32.mrf.mxu1 }
 0x262   : > { %v772_v1 = vadd.f32 %v1873_v59, %v668_v62 }
 0x263   : > { %v1875_v8 = vpop.f32.mrf.mxu1 }
 0x264   : > { %v1876_v55 = vadd.f32 %v1875_v8, %v1874_v7  ;;  %v810_v8 = vmax.f32 %v772_v1, 0.0 }
 0x265   : > { %v1877_v11 = vpop.f32.mrf.mxu1 }
 0x266   : > { %v777_v63 = vadd.f32 %v1876_v55, %v673_v58 }
 0x267   : > { %v1878_v12 = vpop.f32.mrf.mxu1 }
 0x268   : > { %v1879_v52 = vadd.f32 %v1878_v12, %v1877_v11  ;;  %v811_v7 = vmax.f32 %v777_v63, 0.0  ;;  %v821_v11 = vld [vmem:[#allocation3 + $0x130] sm:$0xff]  ;;  %v822_v12 = vld [vmem:[#allocation3 + $0x140] sm:$0xff] }
 0x269   : > { %v1880_v15 = vpop.f32.mrf.mxu1 }
 0x26a   : > { %v782_v60 = vadd.f32 %v1879_v52, %v678_v51 }
 0x26b   : > { %v1881_v18 = vpop.f32.mrf.mxu1 }
 0x26c   : > { %v1882_v46 = vadd.f32 %v1881_v18, %v1880_v15  ;;  %v812_v2 = vmax.f32 %v782_v60, 0.0  ;;  %v823_v15 = vld [vmem:[#allocation3 + $0x150] sm:$0xff]  ;;  %v824_v18 = vld [vmem:[#allocation3 + $0x160] sm:$0xff] }
 0x26d   : > { %v1883_v19 = vpop.f32.mrf.mxu1 }
 0x26e   : > { %v787_v56 = vadd.f32 %v1882_v46, %v683_v45 }
 0x26f   : > { %v1884_v20 = vpop.f32.mrf.mxu1 }
 0x270   : > { %v1885_v42 = vadd.f32 %v1884_v20, %v1883_v19  ;;  %v813_v0 = vmax.f32 %v787_v56, 0.0  ;;  %v825_v19 = vld [vmem:[#allocation3 + $0x170] sm:$0xff]  ;;  %v856_v20 = vpop.permute.xlu1 %855 }
 0x271   : > { %v1886_v21 = vpop.f32.mrf.mxu1 }
 0x272   : > { %v792_v53 = vadd.f32 %v1885_v42, %v688_v34  ;;  %v2590_v34 = vld [vmem:[%s286_s9] ss:$0 sm:$0xff] }
 0x273   : > { %v1887_v23 = vpop.f32.mrf.mxu1 }
 0x274   : > { %v1888_v38 = vadd.f32 %v1887_v23, %v1886_v21  ;;  %v814_v61 = vmax.f32 %v792_v53, 0.0  ;;  %v852_v21 = vpop.permute.xlu0 %851 }
 0x275   : > { %v1889_v26 = vpop.f32.mrf.mxu1 }
 0x276   : > { %v797_v47 = vadd.f32 %v1888_v38, %v693_v29 }
 0x277   : > { %v1890_v27 = vpop.f32.mrf.mxu1 }
 0x278   : > { %v1891_v32 = vadd.f32 %v1890_v27, %v1889_v26  ;;  %v815_v57 = vmax.f32 %v797_v47, 0.0  ;;  %v840_v26 = vpop.permute.xlu0 %839 }
 0x279   : > { %v1892_v30 = vpop.f32.mrf.mxu1 }
 0x27a   : > { %v802_v43 = vadd.f32 %v1891_v32, %v698_v22 }
 0x27b   : > { %v1893_v36 = vpop.f32.mrf.mxu1 }
 0x27c   : > { %v1894_v40 = vadd.f32 %v1893_v36, %v1892_v30  ;;  %v816_v54 = vmax.f32 %v802_v43, 0.0 }
 0x27e   : > { %v807_v44 = vadd.f32 %v1894_v40, %v703_v25  ;;  %v848_v25 = vpop.permute.xlu1 %847 }
 0x280   : > { %v817_v48 = vmax.f32 %v807_v44, 0.0 }
 0x282   : > { %2006 = vmatprep.subr.mxu0 %v817_v48  ;;  %v844_v42 = vpop.permute.xlu1 %843 }
 0x283   : > { %2007 = vmatpush3.msra.mxu0 %v817_v48 }
 0x284   : > { %2008 = vmatprep.subr.mxu0 %v816_v54 }
 0x285   : > { %2009 = vmatpush3.msra.mxu0 %v816_v54 }
 0x286   : > { %2010 = vmatprep.subr.mxu0 %v815_v57  ;;  %v836_v54 = vpop.permute.xlu1 %835 }
 0x287   : > { %2011 = vmatpush3.msra.mxu0 %v815_v57  ;;  %v832_v57 = vpop.permute.xlu0 %831 }
 0x288   : > { %2012 = vmatprep.subr.mxu0 %v814_v61 }
 0x289   : > { %2013 = vmatpush3.msra.mxu0 %v814_v61 }
 0x28a   : > { %2014 = vmatprep.subr.mxu0 %v813_v0  ;;  %v828_v60 = vpop.permute.xlu1 %827 }
 0x28b   : > { %2015 = vmatpush3.msra.mxu0 %v813_v0  ;;  %v2299_v0 = vmov 3  }
 0x28c   : > { %2016 = vmatprep.subr.mxu0 %v812_v2  ;;  %2160 = vset.pattern.permute.xlu0 %v2299_v0 }
 0x28d   : > { %2017 = vmatpush3.msra.mxu0 %v812_v2  ;;  %2161 = vset.pattern.permute.xlu1 %v2299_v0 }
 0x28e   : > { %2018 = vmatprep.subr.mxu0 %v811_v7 }
 0x28f   : > { %2019 = vmatpush3.msra.mxu0 %v811_v7 }
 0x290   : > { %2020 = vmatprep.subr.mxu0 %v810_v8 }
 0x291   : > { %2021 = vmatpush3.msra.mxu0 %v810_v8 }
 0x292   : > { %2023 = vmatmul.mubr.msk.f32.vlgmr.msra.gmra.mxu0 %vm858_vm1, %v819_v3 }
 0x293   : > { %2025 = vmatprep.mubr.msk.f32.mxu0 %vm858_vm1, %v820_v4  ;;  %v1812_v4 = vld [vmem:[%s2826_s2 + $0x5] ss:$0 sm:$0xff] }
 0x296   : > { %2026 = vmatmul.mubr.msk.f32.gmra.mxu0 %vm858_vm1, %v821_v11  ;;  %v1809_v11 = vld [vmem:[%s2826_s2 + $0x4] ss:$0 sm:$0xff] }
 0x297   : > { %2028 = vmatprep.mubr.msk.f32.mxu0 %vm858_vm1, %v822_v12 }
 0x29a   : > { %2029 = vmatmul.mubr.msk.f32.gmra.mxu0 %vm858_vm1, %v823_v15 }
 0x29b   : > { %2031 = vmatprep.mubr.msk.f32.mxu0 %vm858_vm1, %v824_v18 }
 0x29e   : > { %2032 = vmatmul.mubr.msk.f32.gmra.mxu0 %vm858_vm1, %v825_v19 }
 0x352   : > { %v2024_v22 = vpop.f32.mrf.mxu0 }
 0x353   : > { %v955_v58 = vadd.f32 %v2024_v22, %v832_v57 }
 0x354   : > { %v949_v23 = vpop.f32.mrf.mxu0 }
 0x355   : > { %v989_v61 = vadd.f32 %v955_v58, %v2507_v39 }
 0x356   : > { %v2027_v27 = vpop.f32.mrf.mxu0 }
 0x357   : > { %v965_v29 = vadd.f32 %v2027_v27, %v840_v26 }
 0x358   : > { %v959_v30 = vpop.f32.mrf.mxu0 }
 0x359   : > { %v991_v32 = vadd.f32 %v965_v29, %v2473_v24 }
 0x35a   : > { %v2030_v36 = vpop.f32.mrf.mxu0 }
 0x35b   : > { %v2593_v38 = vmul.f32 %v2590_v34, %v991_v32  ;;  %v975_v40 = vadd.f32 %v2030_v36, %v848_v25 }
 0x35c   : > { %v969_v43 = vpop.f32.mrf.mxu0 }
 0x35d   : > { %v993_v44 = vadd.f32 %v975_v40, %v2477_v28  ;;  %v970_v45 = vadd.f32 %v969_v43, %v844_v42  ;;  %1041 = vrot.lane.b32.xlu1 %v2593_v38, %s2293_s11 }
 0x35e   : > { %v2033_v46 = vpop.f32.mrf.mxu0 }
 0x35f   : > { %v2599_v47 = vmul.f32 %v2590_v34, %v993_v44  ;;  %v992_v24 = vadd.f32 %v970_v45, %v2483_v31  ;;  %v985_v48 = vadd.f32 %v2033_v46, %v856_v20  ;;  %v960_v31 = vadd.f32 %v959_v30, %v836_v54 }
 0x360   : > { %v979_v51 = vpop.f32.mrf.mxu0 }
 0x361   : > { %1058 = vrot.lane.b32.xlu1 %v2599_v47, %s2297_s17  ;;  %1125 = vrot.lane.b32.xlu0 %v2599_v47, %s2298_s12  ;;  %v2605_v28 = vmul.f32 %v2590_v34, %v992_v24  ;;  %v995_v52 = vadd.f32 %v985_v48, %v2489_v33  ;;  %v980_v53 = vadd.f32 %v979_v51, %v852_v21 }
 0x362   : > { %v990_v33 = vadd.f32 %v960_v31, %v2501_v37  ;;  %v2631_v37 = vmul.f32 %v2590_v34, %v989_v61 }
 0x363   : > { %v2611_v55 = vmul.f32 %v2590_v34, %v995_v52  ;;  %v994_v56 = vadd.f32 %v980_v53, %v2495_v35  ;;  %v950_v35 = vadd.f32 %v949_v23, %v828_v60 }
 0x364   : > { %v2625_v62 = vmul.f32 %v2590_v34, %v990_v33 }
 0x365   : > { %1056 = vrot.lane.b32.xlu1 %v2605_v28, %s2297_s17  ;;  %1123 = vrot.lane.b32.xlu0 %v2605_v28, %s2298_s12  ;;  %v2618_v59 = vmul.f32 %v2590_v34, %v994_v56  ;;  %v988_v63 = vadd.f32 %v950_v35, %v2513_v41  ;;  %v1145_v41 = vld [vmem:[#allocation3 + $0x188] sm:$0xff] }
 0x366   : > { %1304 = vmatprep.mubr.f32.mxu0 %v1145_v41 }
 0x367   : > { %v2639_v39 = vmul.f32 %v2590_v34, %v988_v63 }
 0x369   : > { %1062 = vrot.lane.b32.xlu1 %v2611_v55, %s2297_s17  ;;  %1129 = vrot.lane.b32.xlu0 %v2611_v55, %s2298_s12 }
 0x36d   : > { %1060 = vrot.lane.b32.xlu1 %v2618_v59, %s2297_s17  ;;  %1108 = vrot.lane.b32.xlu0 %v2611_v55, %s2293_s11  ;;  %s2763_s17 = scalar_lea.hbm %s2829_s5, %s1829_s28 }
 0x371   : > { %1127 = vrot.lane.b32.xlu0 %v2618_v59, %s2298_s12  ;;  %1039 = vrot.lane.b32.xlu1 %v2625_v62, %s2293_s11  ;;  %s1629_s12 = scalar_lea.sflag [#allocation5], %s2724_s18 }
 0x375   : > { %1104 = vrot.lane.b32.xlu0 %v2599_v47, %s2293_s11  ;;  %1037 = vrot.lane.b32.xlu1 %v2631_v37, %s2293_s11 }
 0x379   : > { %1106 = vrot.lane.b32.xlu0 %v2618_v59, %s2293_s11  ;;  %1035 = vrot.lane.b32.xlu1 %v2639_v39, %s2293_s11 }
 0x37d   : > { %1102 = vrot.lane.b32.xlu0 %v2605_v28, %s2293_s11  ;;  %1016 = vrot.lane.b32.xlu1 %v2593_v38, %s2292_s10  ;;  %s2304_s11 = smov [#allocation6]  }
 0x37e   : > { %s2195_s13 = sshll.u32 %s2304_s11, 4  ;;  %s2196_s13 = int_to_ptr.vmem [resolvable:$false] %s2195_s13 }
 0x37f   : > { %s2197_s14 = scalar_lea.vmem %s2196_s13, 1024  ;;  %p2198_p11 = scmp.lt.s32.totalorder %s2757_s26, %s2196_s13 }
 0x381   : > { %1083 = vrot.lane.b32.xlu0 %v2611_v55, %s2292_s10  ;;  %1014 = vrot.lane.b32.xlu1 %v2625_v62, %s2292_s10 }
 0x385   : > { %1079 = vrot.lane.b32.xlu0 %v2599_v47, %s2292_s10  ;;  %1012 = vrot.lane.b32.xlu1 %v2631_v37, %s2292_s10 }
 0x389   : > { %1081 = vrot.lane.b32.xlu0 %v2618_v59, %s2292_s10  ;;  %1010 = vrot.lane.b32.xlu1 %v2639_v39, %s2292_s10 }
 0x38d   : > { %1077 = vrot.lane.b32.xlu0 %v2605_v28, %s2292_s10  ;;  %1232 = vperm.xlu1 %2161, %v2435_v9   ;;  %s2191_s10 = scalar_lea.vmem %s2757_s26, 512 }
 0x38e   : > { %p2192_p6 = scmp.ne.s32.totalorder %s2757_s26, %s2191_s10  ;;  %p2199_p12 = scmp.lt.s32.totalorder %s2197_s14, %s2191_s10 }
 0x390   : > { %p2193_p9 = pnand %p2192_p6, %p2381_p5  ;;  %p2200_p13 = por %p2199_p12, %p2198_p11 }
 0x391   : > { %1237 = vperm.xlu0 %2160, %v2422_v5   ;;  %1227 = vperm.xlu1 %2161, %v2427_v6  }
 0x392   : > { %p2194_p10 = pneg %p2193_p9 }
 0x394   : > { %p2201_p0 = pnand %p2200_p13, %p2194_p10 }
 0x395   : > { %1222 = vperm.xlu0 %2160, %v2440_v10   ;;  %1217 = vperm.xlu1 %2161, %v2449_v13  }
 0x399   : > { %1212 = vperm.xlu0 %2160, %v2454_v14   ;;  %1207 = vperm.xlu1 %2161, %v2463_v16  }
 0x39d   : > { %1202 = vperm.xlu0 %2160, %v2468_v17  }
 0x3cf   : > { %v1042_v1 = vpop.permute.xlu1 %1041 }
 0x3d0   : > { %v1051_v43 = vmul.f32 %v2545_v50, %v1042_v1 }
 0x3d3   : > { %v1126_v2 = vpop.permute.xlu0 %1125  ;;  %v1059_v7 = vpop.permute.xlu1 %1058 }
 0x3d4   : > { %v1137_v27 = vmul.f32 %v1812_v4, %v1126_v2  ;;  %v1070_v29 = vmul.f32 %v1809_v11, %v1059_v7 }
 0x3d7   : > { %v1124_v8 = vpop.permute.xlu0 %1123  ;;  %v1057_v3 = vpop.permute.xlu1 %1056 }
 0x3d8   : > { %v1136_v36 = vmul.f32 %v1812_v4, %v1124_v8  ;;  %v1069_v40 = vmul.f32 %v1809_v11, %v1057_v3  ;;  %v1144_v3 = vld [vmem:[#allocation3 + $0x180] sm:$0xff] }
 0x3db   : > { %v1130_v12 = vpop.permute.xlu0 %1129  ;;  %v1063_v15 = vpop.permute.xlu1 %1062 }
 0x3dc   : > { %v1139_v18 = vmul.f32 %v1812_v4, %v1130_v12  ;;  %v1072_v19 = vmul.f32 %v1809_v11, %v1063_v15  ;;  %v1149_v12 = vld [vmem:[#allocation3 + $0x1a8] sm:$0xff]  ;;  %v1148_v15 = vld [vmem:[#allocation3 + $0x1a0] sm:$0xff] }
 0x3de   : > { %1911 = vmatprep.subr.mxu0 %v1139_v18  ;;  %v1151_v18 = vld [vmem:[#allocation3 + $0x1b8] sm:$0xff] }
 0x3df   : > { %v1109_v20 = vpop.permute.xlu0 %1108  ;;  %1912 = vmatpush3.msra.mxu0 %v1072_v19  ;;  %v1061_v21 = vpop.permute.xlu1 %1060  ;;  %v1150_v19 = vld [vmem:[#allocation3 + $0x1b0] sm:$0xff] }
 0x3e0   : > { %v1071_v26 = vmul.f32 %v1809_v11, %v1061_v21  ;;  %v1118_v42 = vmul.f32 %v2545_v50, %v1109_v20  ;;  %v1146_v11 = vld [vmem:[#allocation3 + $0x190] sm:$0xff]  ;;  %v1153_v20 = vld [vmem:[#allocation3 + $0x1c8] sm:$0xff]  ;;  %v1155_v21 = vld [vmem:[#allocation3 + $0x1d8] sm:$0xff] }
 0x3e3   : > { %v1128_v22 = vpop.permute.xlu0 %1127  ;;  %v1040_v23 = vpop.permute.xlu1 %1039 }
 0x3e4   : > { %v1138_v25 = vmul.f32 %v1812_v4, %v1128_v22  ;;  %v1050_v24 = vmul.f32 %v2545_v50, %v1040_v23  ;;  %v1147_v4 = vld [vmem:[#allocation3 + $0x198] sm:$0xff]  ;;  %v1154_v22 = vld [vmem:[#allocation3 + $0x1d0] sm:$0xff]  ;;  %v1157_v23 = vld [vmem:[#allocation3 + $0x1e8] sm:$0xff] }
 0x3e6   : > { %1913 = vmatprep.subr.mxu0 %v1138_v25  ;;  %v1156_v25 = vld [vmem:[#allocation3 + $0x1e0] sm:$0xff] }
 0x3e7   : > { %v1105_v30 = vpop.permute.xlu0 %1104  ;;  %1914 = vmatpush3.msra.mxu0 %v1071_v26  ;;  %v1038_v32 = vpop.permute.xlu1 %1037  ;;  %v1159_v26 = vld [vmem:[#allocation3 + $0x1f8] sm:$0xff] }
 0x3e8   : > { %1915 = vmatprep.subr.mxu0 %v1137_v27  ;;  %v1116_v48 = vmul.f32 %v2545_v50, %v1105_v30  ;;  %v1049_v51 = vmul.f32 %v2545_v50, %v1038_v32  ;;  %v1158_v27 = vld [vmem:[#allocation3 + $0x1f0] sm:$0xff]  ;;  %v2300_v30 = vmov 4  }
 0x3e9   : > { %1916 = vmatpush3.msra.mxu0 %v1070_v29  ;;  %v1353_v29 = vld [vmem:[#allocation3 + $0x200] sm:$0xff]  ;;  %2162 = vset.pattern.permute.xlu1 %v2300_v30 }
 0x3ea   : > { %1917 = vmatprep.subr.mxu0 %v1136_v36  ;;  %2050 = vmatprep.mubr.msk.f32.mxu1 %vm858_vm1, %v1353_v29  ;;  %v1359_v29 = vld [vmem:[#allocation3 + $0x260] sm:$0xff] }
 0x3eb   : > { %v1107_v44 = vpop.permute.xlu0 %1106  ;;  %1918 = vmatpush3.msra.mxu0 %v1069_v40  ;;  %v1036_v45 = vpop.permute.xlu1 %1035  ;;  %2163 = vset.pattern.permute.xlu0 %v2300_v30  ;;  %v1360_v30 = vld [vmem:[#allocation3 + $0x270] sm:$0xff] }
 0x3ec   : > { %v1117_v46 = vmul.f32 %v2545_v50, %v1107_v44  ;;  %1919 = vmatprep.subr.mxu0 %v1118_v42  ;;  %v1048_v31 = vmul.f32 %v2545_v50, %v1036_v45  ;;  %1390 = vperm.xlu1 %2162, %v2422_v5  }
 0x3ed   : > { %1920 = vmatpush3.msra.mxu0 %v1051_v43  ;;  %1386 = vperm.xlu0 %2163, %v2435_v9  }
 0x3ee   : > { %1921 = vmatprep.subr.mxu0 %v1117_v46 }
 0x3ef   : > { %v1103_v52 = vpop.permute.xlu0 %1102  ;;  %1922 = vmatpush3.msra.mxu0 %v1050_v24  ;;  %v1017_v53 = vpop.permute.xlu1 %1016 }
 0x3f0   : > { %v1115_v54 = vmul.f32 %v2545_v50, %v1103_v52  ;;  %1923 = vmatprep.subr.mxu0 %v1116_v48  ;;  %v1026_v60 = vmul.f32 %v2540_v49, %v1017_v53  ;;  %1382 = vperm.xlu1 %2162, %v2427_v6  }
 0x3f1   : > { %1924 = vmatpush3.msra.mxu0 %v1049_v51  ;;  %1374 = vperm.xlu0 %2163, %v2449_v13  }
 0x3f2   : > { %1925 = vmatprep.subr.mxu0 %v1115_v54 }
 0x3f3   : > { %v1084_v56 = vpop.permute.xlu0 %1083  ;;  %1926 = vmatpush3.msra.mxu0 %v1048_v31  ;;  %v1015_v57 = vpop.permute.xlu1 %1014 }
 0x3f4   : > { %1927 = vmatprep.subr.mxu0 %v2611_v55  ;;  %v1093_v50 = vmul.f32 %v2540_v49, %v1084_v56  ;;  %v1025_v63 = vmul.f32 %v2540_v49, %v1015_v57  ;;  %1378 = vperm.xlu1 %2162, %v2440_v10  }
 0x3f5   : > { %1928 = vmatpush3.msra.mxu0 %v2593_v38  ;;  %1366 = vperm.xlu0 %2163, %v2463_v16  }
 0x3f6   : > { %1929 = vmatprep.subr.mxu0 %v2618_v59 }
 0x3f7   : > { %v1080_v58 = vpop.permute.xlu0 %1079  ;;  %1930 = vmatpush3.msra.mxu0 %v2625_v62  ;;  %v1013_v33 = vpop.permute.xlu1 %1012 }
 0x3f8   : > { %1931 = vmatprep.subr.mxu0 %v2599_v47  ;;  %v1091_v41 = vmul.f32 %v2540_v49, %v1080_v58  ;;  %v1024_v1 = vmul.f32 %v2540_v49, %v1013_v33  ;;  %1370 = vperm.xlu1 %2162, %v2454_v14  }
 0x3f9   : > { %1932 = vmatpush3.msra.mxu0 %v2631_v37 }
 0x3fa   : > { %1933 = vmatprep.subr.mxu0 %v2605_v28 }
 0x3fb   : > { %v1082_v61 = vpop.permute.xlu0 %1081  ;;  %1934 = vmatpush3.msra.mxu0 %v2639_v39  ;;  %v1011_v0 = vpop.permute.xlu1 %1010 }
 0x3fc   : > { %v1092_v35 = vmul.f32 %v2540_v49, %v1082_v61  ;;  %1935 = vmatprep.subr.mxu0 %v1093_v50  ;;  %v1023_v8 = vmul.f32 %v2540_v49, %v1011_v0  ;;  %1362 = vperm.xlu1 %2162, %v2468_v17  }
 0x3fd   : > { %1936 = vmatpush3.msra.mxu0 %v1026_v60 }
 0x3fe   : > { %1937 = vmatprep.subr.mxu0 %v1092_v35 }
 0x3ff   : > { %v1078_v2 = vpop.permute.xlu0 %1077  ;;  %1938 = vmatpush3.msra.mxu0 %v1025_v63 }
 0x400   : > { %v1090_v7 = vmul.f32 %v2540_v49, %v1078_v2  ;;  %1939 = vmatprep.subr.mxu0 %v1091_v41  ;;  %v1152_v49 = vld [vmem:[#allocation3 + $0x1c0] sm:$0xff] }
 0x401   : > { %1940 = vmatpush3.msra.mxu0 %v1024_v1 }
 0x402   : > { %1941 = vmatprep.subr.mxu0 %v1090_v7 }
 0x403   : > { %1942 = vmatpush3.msra.mxu0 %v1023_v8 }
 0x404   : > { %1305 = vmatmul.mubr.f32.vlgmr.msra.gmra.mxu0 %v1144_v3 }
 0x405   : > { %1309 = vmatprep.mubr.f32.mxu0 %v1147_v4 }
 0x408   : > { %1310 = vmatmul.mubr.f32.gmra.mxu0 %v1146_v11  ;;  %v1233_v13 = vpop.permute.xlu1 %1232 }
 0x409   : > { %1314 = vmatprep.mubr.f32.mxu0 %v1149_v12 }
 0x40c   : > { %1315 = vmatmul.mubr.f32.gmra.mxu0 %v1148_v15  ;;  %v1238_v10 = vpop.permute.xlu0 %1237  ;;  %v1228_v51 = vpop.permute.xlu1 %1227 }
 0x40d   : > { %1319 = vmatprep.mubr.f32.mxu0 %v1151_v18 }
 0x410   : > { %1320 = vmatmul.mubr.f32.gmra.mxu0 %v1150_v19  ;;  %v1223_v17 = vpop.permute.xlu0 %1222  ;;  %v1218_v33 = vpop.permute.xlu1 %1217 }
 0x411   : > { %1324 = vmatprep.mubr.f32.mxu0 %v1153_v20 }
 0x414   : > { %1325 = vmatmul.mubr.f32.gmra.mxu0 %v1152_v49  ;;  %v1213_v35 = vpop.permute.xlu0 %1212  ;;  %v1208_v8 = vpop.permute.xlu1 %1207 }
 0x415   : > { %1329 = vmatprep.mubr.f32.mxu0 %v1155_v21 }
 0x418   : > { %1330 = vmatmul.mubr.f32.gmra.mxu0 %v1154_v22  ;;  %v1203_v12 = vpop.permute.xlu0 %1202  ;;  %v1354_v22 = vld [vmem:[#allocation3 + $0x210] sm:$0xff] }
 0x419   : > { %1334 = vmatprep.mubr.f32.mxu0 %v1157_v23  ;;  %v1355_v23 = vld [vmem:[#allocation3 + $0x220] sm:$0xff] }
 0x41c   : > { %1335 = vmatmul.mubr.f32.gmra.mxu0 %v1156_v25  ;;  %v1356_v25 = vld [vmem:[#allocation3 + $0x230] sm:$0xff] }
 0x41d   : > { %1339 = vmatprep.mubr.f32.mxu0 %v1159_v26  ;;  %v1357_v26 = vld [vmem:[#allocation3 + $0x240] sm:$0xff] }
 0x420   : > { %1340 = vmatmul.mubr.f32.gmra.mxu0 %v1158_v27  ;;  %v1358_v27 = vld [vmem:[#allocation3 + $0x250] sm:$0xff] }
 0x4c4   : > { %v1943_v32 = vpop.f32.mrf.mxu0 }
 0x4c6   : > { %v1944_v36 = vpop.f32.mrf.mxu0 }
 0x4c7   : > { %v1945_v3 = vadd.f32 %v1944_v36, %v1943_v32  ;;  %v2301_v32 = vmov 0.0   ;;  %v1543_v36 = vld [vmem:[%s2828_s4] sm:$0xff] }
 0x4c8   : > { %v1946_v40 = vpop.f32.mrf.mxu0 }
 0x4c9   : > { %v1307_v19 = vadd.f32 %v1945_v3, %v1203_v12 }
 0x4ca   : > { %v1947_v42 = vpop.f32.mrf.mxu0 }
 0x4cb   : > { %v1948_v1 = vadd.f32 %v1947_v42, %v1946_v40  ;;  %v1345_v21 = vmax.f32 %v1307_v19, 0.0  ;;  %v2303_v40 = vmov 5   ;;  %v1391_v42 = vpop.permute.xlu1 %1390 }
 0x4cc   : > { %v1949_v43 = vpop.f32.mrf.mxu0  ;;  %2164 = vset.pattern.permute.xlu0 %v2303_v40 }
 0x4cd   : > { %v1312_v15 = vadd.f32 %v1948_v1, %v1208_v8  ;;  %1546 = vperm.xlu0 %2164, %v1543_v36  }
 0x4ce   : > { %v1950_v5 = vpop.f32.mrf.mxu0 }
 0x4cf   : > { %v1951_v63 = vadd.f32 %v1950_v5, %v1949_v43  ;;  %v1346_v49 = vmax.f32 %v1312_v15, 0.0  ;;  %v1383_v43 = vpop.permute.xlu1 %1382  ;;  %v1387_v5 = vpop.permute.xlu0 %1386 }
 0x4d0   : > { %v1952_v44 = vpop.f32.mrf.mxu0 }
 0x4d1   : > { %v1317_v4 = vadd.f32 %v1951_v63, %v1213_v35 }
 0x4d2   : > { %v1953_v9 = vpop.f32.mrf.mxu0 }
 0x4d3   : > { %v1954_v50 = vadd.f32 %v1953_v9, %v1952_v44  ;;  %v1347_v20 = vmax.f32 %v1317_v4, 0.0  ;;  %v1379_v44 = vpop.permute.xlu1 %1378  ;;  %v1375_v9 = vpop.permute.xlu0 %1374 }
 0x4d4   : > { %v1955_v45 = vpop.f32.mrf.mxu0 }
 0x4d5   : > { %v1322_v2 = vadd.f32 %v1954_v50, %v1218_v33 }
 0x4d6   : > { %v1956_v6 = vpop.f32.mrf.mxu0 }
 0x4d7   : > { %v1957_v56 = vadd.f32 %v1956_v6, %v1955_v45  ;;  %v1348_v18 = vmax.f32 %v1322_v2, 0.0  ;;  %v1371_v45 = vpop.permute.xlu1 %1370 }
 0x4d8   : > { %v1958_v46 = vpop.f32.mrf.mxu0 }
 0x4d9   : > { %v1327_v41 = vadd.f32 %v1957_v56, %v1223_v17 }
 0x4da   : > { %v1959_v24 = vpop.f32.mrf.mxu0 }
 0x4db   : > { %v1960_v54 = vadd.f32 %v1959_v24, %v1958_v46  ;;  %v1349_v11 = vmax.f32 %v1327_v41, 0.0  ;;  %v1367_v46 = vpop.permute.xlu0 %1366  ;;  %v1363_v24 = vpop.permute.xlu1 %1362 }
 0x4dc   : > { %v1961_v48 = vpop.f32.mrf.mxu0 }
 0x4dd   : > { %v1332_v60 = vadd.f32 %v1960_v54, %v1228_v51 }
 0x4de   : > { %v1962_v16 = vpop.f32.mrf.mxu0 }
 0x4df   : > { %v1963_v52 = vadd.f32 %v1962_v16, %v1961_v48  ;;  %v1350_v7 = vmax.f32 %v1332_v60, 0.0 }
 0x4e0   : > { %v1964_v14 = vpop.f32.mrf.mxu0 }
 0x4e1   : > { %v1337_v57 = vadd.f32 %v1963_v52, %v1233_v13 }
 0x4e2   : > { %v1965_v53 = vpop.f32.mrf.mxu0 }
 0x4e3   : > { %v1966_v31 = vadd.f32 %v1965_v53, %v1964_v14  ;;  %v1351_v0 = vmax.f32 %v1337_v57, 0.0 }
 0x4e5   : > { %v1342_v58 = vadd.f32 %v1966_v31, %v1238_v10 }
 0x4e7   : > { %v1352_v61 = vmax.f32 %v1342_v58, 0.0 }
 0x4e9   : > { %2034 = vmatprep.subr.mxu1 %v1352_v61 }
 0x4ea   : > { %2035 = vmatpush3.msra.mxu1 %v1352_v61 }
 0x4eb   : > { %2036 = vmatprep.subr.mxu1 %v1351_v0 }
 0x4ec   : > { %2037 = vmatpush3.msra.mxu1 %v1351_v0 }
 0x4ed   : > { %2038 = vmatprep.subr.mxu1 %v1350_v7 }
 0x4ee   : > { %2039 = vmatpush3.msra.mxu1 %v1350_v7 }
 0x4ef   : > { %2040 = vmatprep.subr.mxu1 %v1349_v11 }
 0x4f0   : > { %2041 = vmatpush3.msra.mxu1 %v1349_v11 }
 0x4f1   : > { %2042 = vmatprep.subr.mxu1 %v1348_v18 }
 0x4f2   : > { %2043 = vmatpush3.msra.mxu1 %v1348_v18 }
 0x4f3   : > { %2044 = vmatprep.subr.mxu1 %v1347_v20 }
 0x4f4   : > { %2045 = vmatpush3.msra.mxu1 %v1347_v20 }
 0x4f5   : > { %2046 = vmatprep.subr.mxu1 %v1346_v49 }
 0x4f6   : > { %2047 = vmatpush3.msra.mxu1 %v1346_v49 }
 0x4f7   : > { %2048 = vmatprep.subr.mxu1 %v1345_v21 }
 0x4f8   : > { %2049 = vmatpush3.msra.mxu1 %v1345_v21 }
 0x4f9   : > { %2051 = vmatmul.mubr.msk.f32.vlgmr.msra.gmra.mxu1 %vm858_vm1, %v1354_v22  ;;  %2062 = vmatprep.subr.mxu1 %v2301_v32 }
 0x4fa   : > { %2053 = vmatprep.mubr.msk.f32.mxu1 %vm858_vm1, %v1355_v23 }
 0x4fd   : > { %2054 = vmatmul.mubr.msk.f32.gmra.mxu1 %vm858_vm1, %v1356_v25 }
 0x4fe   : > { %2056 = vmatprep.mubr.msk.f32.mxu1 %vm858_vm1, %v1357_v26 }
 0x501   : > { %2057 = vmatmul.mubr.msk.f32.gmra.mxu1 %vm858_vm1, %v1358_v27 }
 0x502   : > { %2059 = vmatprep.mubr.msk.f32.mxu1 %vm858_vm1, %v1359_v29 }
 0x505   : > { %2060 = vmatmul.mubr.msk.f32.gmra.mxu1 %vm858_vm1, %v1360_v30 }
 0x506   : > { %2078 = vmatprep.mubr.msk.f32.mxu1 %vm2302_vm2, %v2301_v32 }
 0x5b9   : > { %v2052_v6 = vpop.f32.mrf.mxu1 }
 0x5ba   : > { %v1489_v10 = vadd.f32 %v2052_v6, %v1367_v46 }
 0x5bb   : > { %v1483_v13 = vpop.f32.mrf.mxu1 }
 0x5bc   : > { %v1484_v16 = vadd.f32 %v1483_v13, %v1363_v24  ;;  %v1523_v14 = vadd.f32 %v1489_v10, %v2631_v37 }
 0x5bd   : > { %v2055_v48 = vpop.f32.mrf.mxu1 }
 0x5be   : > { %v1499_v17 = vadd.f32 %v2055_v48, %v1375_v9  ;;  %v1522_v54 = vadd.f32 %v1484_v16, %v2639_v39  ;;  %v1531_v33 = vmul.f32 %v2590_v34, %v1523_v14 }
 0x5bf   : > { %v1493_v51 = vpop.f32.mrf.mxu1 }
 0x5c0   : > { %v1494_v31 = vadd.f32 %v1493_v51, %v1371_v45  ;;  %v1525_v60 = vadd.f32 %v1499_v17, %v2593_v38  ;;  %v1530_v63 = vmul.f32 %v2590_v34, %v1522_v54 }
 0x5c1   : > { %v2058_v52 = vpop.f32.mrf.mxu1 }
 0x5c2   : > { %v1509_v53 = vadd.f32 %v2058_v52, %v1383_v43  ;;  %v1524_v39 = vadd.f32 %v1494_v31, %v2625_v62  ;;  %v1533_v7 = vmul.f32 %v2590_v34, %v1525_v60 }
 0x5c3   : > { %v1503_v56 = vpop.f32.mrf.mxu1 }
 0x5c4   : > { %v1527_v57 = vadd.f32 %v1509_v53, %v2599_v47  ;;  %v1504_v58 = vadd.f32 %v1503_v56, %v1379_v44  ;;  %v1532_v8 = vmul.f32 %v2590_v34, %v1524_v39 }
 0x5c5   : > { %v2061_v50 = vpop.f32.mrf.mxu1 }
 0x5c6   : > { %v1535_v37 = vmul.f32 %v2590_v34, %v1527_v57  ;;  %v1526_v61 = vadd.f32 %v1504_v58, %v2605_v28  ;;  %v1519_v35 = vadd.f32 %v2061_v50, %v1391_v42 }
 0x5c7   : > { %v1513_v41 = vpop.f32.mrf.mxu1 }
 0x5c8   : > { %v1539_v0 = vadd.f32 %v1535_v37, %v1531_v33  ;;  %v1534_v1 = vmul.f32 %v2590_v34, %v1526_v61  ;;  %v1529_v47 = vadd.f32 %v1519_v35, %v2611_v55  ;;  %v1514_v2 = vadd.f32 %v1513_v41, %v1387_v5 }
 0x5ca   : > { %1624 = vst [vmem:[%s2738_s20 + $0x8] sm:$0xff] %v1539_v0  ;;  %v1538_v38 = vadd.f32 %v1534_v1, %v1530_v63  ;;  %v1537_v28 = vmul.f32 %v2590_v34, %v1529_v47  ;;  %v1528_v62 = vadd.f32 %v1514_v2, %v2618_v59  ;;  %v1542_v59 = vld [vmem:[#allocation3 + $0x280] sm:$0xff] }
 0x5cc   : > { %1623 = vst [vmem:[%s2738_s20] sm:$0xff] %v1538_v38  ;;  %v1541_v3 = vadd.f32 %v1537_v28, %v1533_v7  ;;  %v1536_v55 = vmul.f32 %v2590_v34, %v1528_v62  ;;  %2063 = vmatpush3.msra.mxu1 %v1537_v28 }
 0x5cd   : > { %2064 = vmatprep.subr.mxu1 %v2301_v32 }
 0x5ce   : > { %1626 = vst [vmem:[%s2738_s20 + $0x18] sm:$0xff] %v1541_v3  ;;  %v1540_v4 = vadd.f32 %v1536_v55, %v1532_v8  ;;  %2065 = vmatpush3.msra.mxu1 %v1536_v55 }
 0x5cf   : > { %2066 = vmatprep.subr.mxu1 %v2301_v32 }
 0x5d0   : > { %1625 = vst [vmem:[%s2738_s20 + $0x10] sm:$0xff] %v1540_v4  ;;  %2067 = vmatpush3.msra.mxu1 %v1535_v37 }
 0x5d1   : > { %2068 = vmatprep.subr.mxu1 %v2301_v32 }
 0x5d2   : > { %2069 = vmatpush3.msra.mxu1 %v1534_v1 }
 0x5d3   : > { %2070 = vmatprep.subr.mxu1 %v2301_v32 }
 0x5d4   : > { %2071 = vmatpush3.msra.mxu1 %v1533_v7 }
 0x5d5   : > { %2072 = vmatprep.subr.mxu1 %v2301_v32 }
 0x5d6   : > { %2073 = vmatpush3.msra.mxu1 %v1532_v8 }
 0x5d7   : > { %2074 = vmatprep.subr.mxu1 %v2301_v32 }
 0x5d8   : > { %2075 = vmatpush3.msra.mxu1 %v1531_v33 }
 0x5d9   : > { %2076 = vmatprep.subr.mxu1 %v2301_v32 }
 0x5da   : > { %2077 = vmatpush3.msra.mxu1 %v1530_v63 }
 0x5db   : > { %2079 = vmatmul.mubr.msk.f32.vlgmr.msra.gmra.mxu1 %vm858_vm1, %v1542_v59 }
 0x5dc   : > { %2204 = shalt.err (!%p2201_p0)
}
 0x5dd   : > { %s2205_s15 = scalar_lea.hbm %s2763_s17, 512  ;;  %s2209_s20 = scalar_lea.hbm %s2829_s5, 1024 }
 0x5de   : > { %p2206_p1 = scmp.ne.s32.totalorder %s2763_s17, %s2205_s15  ;;  %p2210_p4 = scmp.lt.s32.totalorder %s2763_s17, %s2829_s5 }
 0x5df   : > { %p2211_p7 = scmp.lt.s32.totalorder %s2209_s20, %s2205_s15 }
 0x5e0   : > { %p2207_p2 = pnand %p2206_p1, %p2381_p5 }
 0x5e1   : > { %p2212_p8 = por %p2211_p7, %p2210_p4 }
 0x5e2   : > { %p2208_p3 = pneg %p2207_p2 }
 0x5e4   : > { %p2213_p6 = pnand %p2212_p8, %p2208_p3 }
 0x5e6   : > { %2216 = shalt.err (!%p2213_p6)
}
 0x5e7   : > { %s2305_s9 = smov 128   ;;  %s2306_s10 = smov 8   ;;  %v1547_v11 = vpop.permute.xlu0 %1546 }
 0x5e8   : > { %2085 = dma.vmem_to_hbm [thread:$0]  (%p2381_p5), %s2757_s26, 512, %s2763_s17, %s1629_s12, %s2305_s9, %s2305_s9, %s2306_s10  }
 0x5e9   : > { %s1782_s11 = sshll.u32 %s2724_s18, 3  ;;  %s1826_s13 = sshll.u32 %s2364_s25, 7 }
 0x5ea   : > { %s279_s14 = scalar_lea.vmem [#allocation7], %s1782_s11  ;;  %s1661_s20 = scalar_lea.hbm %s2830_s6, %s1826_s13 }
 0x5eb   : > { %s1663_s15 = sshll.u32 %s279_s14, 4  ;;  %s1634_s28 = scalar_lea.sflag [#allocation8], %s2724_s18  ;;  %s1664_s15 = int_to_ptr.vmem [resolvable:$true] %s1663_s15 }
 0x5ec   : > { %s2217_s29 = scalar_lea.vmem %s1664_s15, 128  ;;  %s2307_s26 = smov [#allocation7]  }
 0x5ed   : > { %p2218_p9 = scmp.ne.s32.totalorder %s1664_s15, %s2217_s29  ;;  %s2221_s25 = sshll.u32 %s2307_s26, 4  ;;  %s2222_s25 = int_to_ptr.vmem [resolvable:$false] %s2221_s25 }
 0x5ee   : > { %s2223_s17 = scalar_lea.vmem %s2222_s25, 256  ;;  %p2224_p12 = scmp.lt.s32.totalorder %s1664_s15, %s2222_s25 }
 0x5ef   : > { %p2219_p10 = pnand %p2218_p9, %p2381_p5  ;;  %p2225_p13 = scmp.lt.s32.totalorder %s2223_s17, %s2217_s29 }
 0x5f1   : > { %p2220_p11 = pneg %p2219_p10  ;;  %p2226_p0 = por %p2225_p13, %p2224_p12 }
 0x5f3   : > { %p2227_p1 = pnand %p2226_p0, %p2220_p11 }
 0x69b   : > { %v1618_v12 = vpop.f32.mrf.mxu1 }
 0x69c   : > { %v1619_v15 = vadd.f32 %v1618_v12, %v1547_v11 }
 0x69d   : > { %v2080_v18 = vpop.f32.mrf.mxu1 }
 0x69e   : > { %v1622_v19 = vmul.f32 %v2590_v34, %v1619_v15 }
 0x6a0   : > { %1627 = vst [vmem:[%s279_s14] sm:$0xff] %v1622_v19 }
 0x6a1   : > { %2230 = shalt.err (!%p2227_p1)
}
 0x6a2   : > { %s2231_s12 = scalar_lea.hbm %s1661_s20, 128  ;;  %s2235_s10 = scalar_lea.hbm %s2830_s6, 256 }
 0x6a3   : > { %p2232_p2 = scmp.ne.s32.totalorder %s1661_s20, %s2231_s12  ;;  %p2236_p7 = scmp.lt.s32.totalorder %s1661_s20, %s2830_s6 }
 0x6a4   : > { %p2237_p8 = scmp.lt.s32.totalorder %s2235_s10, %s2231_s12 }
 0x6a5   : > { %p2233_p3 = pnand %p2232_p2, %p2381_p5 }
 0x6a6   : > { %p2238_p6 = por %p2237_p8, %p2236_p7 }
 0x6a7   : > { %p2234_p4 = pneg %p2233_p3 }
 0x6a9   : > { %p2239_p9 = pnand %p2238_p6, %p2234_p4 }
 0x6ab   : > { %2242 = shalt.err (!%p2239_p9)
}
 0x6ac   : > { %2086 = dma.vmem_to_hbm [thread:$0]  (%p2381_p5), %s1664_s15, 128, %s1661_s20, %s1634_s28  }
 0x6ad PF: > { %p2102_p10 = scmp.ge.s32.totalorder %s2285_s24, 2  ;;  %s1675_s14 = sand.u32 1, %s2273_s21  }
 0x6ae   : > { %p2834_p11 = scmp.ne.s32.totalorder %s2832_s8, 0  ;;  %s1676_s16 = scalar_lea.sflag [#allocation5], %s1675_s14 }
 0x6b0   : > { %p2094_p12 = pnand %p2102_p10, %p2834_p11 }
 0x6b2   : > { %p2095_p13 = pneg %p2094_p12 }
 0x6b4   : > { %2264 = dma.done.wait (%p2095_p13), %s1676_s16, 512  }
 0x6b5   : > { %2266 = vsyncadd (%p2095_p13), %s1676_s16, 4294966784  ;;  %s1685_s19 = scalar_lea.sflag [#allocation8], %s1675_s14 }
 0x6b6   : > { %2268 = dma.done.wait (%p2095_p13), %s1685_s19, 128  }
 0x6b7   : > { %2270 = vsyncadd (%p2095_p13), %s1685_s19, 4294967168  ;;  %p21_p5 = scmp.ge.s32.totalorder %s2368_s27, 4   ;;  %s2835_s21 = smov %s2277_s22 }
 0x6b8   : > { %s2836_s22 = smov %s2281_s23  ;;  %s2837_s23 = smov %s2379_s30 }
 0x6b9   : > { %s2838_s24 = smov %s2368_s27  ;;  %23 = sbr.rel (!%p21_p5) target bundleno = 6 (0x6), region = 100 }
 0x6be   :  { %1690 = vsyncpa [#allocation4], 1 }
 0x6bf   :  { %1692 = vsyncpa [#allocation4 + $0x1], 1 }
 0x6c0   :  { %1693 = vsyncpa [#allocation5], 1 }
 0x6c1   :  { %1695 = vsyncpa [#allocation5 + $0x1], 1 }
 0x6c2   :  { %1696 = vsyncpa [#allocation8], 1 }
 0x6c3   :  { %1698 = vsyncpa [#allocation8 + $0x1], 1 }

</bundles_post_ra>
